<compile_context>
chip_gen: v6e
topology: v6e:2x2x1
jax: 0.10.0
libtpu: 0.0.40
codegen_flags: <defaults>
</compile_context>

<pallas_src>
import math

import jax
import jax.numpy as jnp
from jax.experimental import pallas as pl


# ---------------------------------------------------------------------------
# Fused Pallas kernel: all RNN layers (both directions) + final Linear.
# ---------------------------------------------------------------------------
def make_fused_kernel(layer_dim, seq, batch, hidden):
    # input order: proj0_f, proj0_b, whh0_f, whh0_b,
    #              [w_ih_f, w_hh_f, b_f, w_ih_b, w_hh_b, b_b] per deeper layer,
    #              fc_w_t, fc_b
    n_in = 4 + 6 * (layer_dim - 1) + 2

    def kernel(*refs):
        in_refs = refs[:n_in]
        fc_out_ref = refs[n_in]
        hn_ref = refs[n_in + 1]

        proj0_f_ref, proj0_b_ref, whh0_f_ref, whh0_b_ref = in_refs[:4]
        idx = 4
        deep = []
        for _ in range(layer_dim - 1):
            deep.append(in_refs[idx:idx + 6])
            idx += 6
        fc_w_ref, fc_b_ref = in_refs[idx], in_refs[idx + 1]

        def run_dir(proj, w_hh, reverse):
            # proj: python list of seq (batch, hidden) values (input projection + bias,
            # already off the serial chain).  Fully unrolled recurrence.
            h = jnp.zeros((batch, hidden), jnp.float32)
            outs = [None] * seq
            order = range(seq - 1, -1, -1) if reverse else range(seq)
            for t in order:
                h = jnp.maximum(
                    proj[t] + jnp.dot(h, w_hh, preferred_element_type=jnp.float32),
                    0.0,
                )
                outs[t] = h
            return outs, h

        # ---- layer 0 (input projection pre-folded by XLA in the wrapper) ----
        proj_f = [proj0_f_ref[t] for t in range(seq)]
        proj_b = [proj0_b_ref[t] for t in range(seq)]
        outs_f, h_f = run_dir(proj_f, whh0_f_ref[...], reverse=False)
        outs_b, h_b = run_dir(proj_b, whh0_b_ref[...], reverse=True)
        hn_ref[0] = h_f
        hn_ref[1] = h_b
        # lane-dense (batch, 2H) activations for the next layer; stays in VMEM/vregs.
        xs = [jnp.concatenate([outs_f[t], outs_b[t]], axis=-1) for t in range(seq)]

        # ---- deeper layers ----
        for l in range(1, layer_dim):
            wih_f_ref, whh_f_ref, bf_ref, wih_b_ref, whh_b_ref, bb_ref = deep[l - 1]
            wih_f = wih_f_ref[...]
            bf = bf_ref[...]
            wih_b = wih_b_ref[...]
            bb = bb_ref[...]
            # hoisted per-timestep input projections (no dependence on h => off the
            # sequential critical path; scheduler overlaps them with the recurrence).
            proj_f = [jnp.dot(xs[t], wih_f, preferred_element_type=jnp.float32) + bf
                      for t in range(seq)]
            proj_b = [jnp.dot(xs[t], wih_b, preferred_element_type=jnp.float32) + bb
                      for t in range(seq)]
            outs_f, h_f = run_dir(proj_f, whh_f_ref[...], reverse=False)
            outs_b, h_b = run_dir(proj_b, whh_b_ref[...], reverse=True)
            hn_ref[2 * l] = h_f
            hn_ref[2 * l + 1] = h_b
            xs = [jnp.concatenate([outs_f[t], outs_b[t]], axis=-1) for t in range(seq)]

        # ---- final Linear on hn[-1] (last layer, backward direction) ----
        fc_out_ref[...] = (
            jnp.dot(h_b, fc_w_ref[...], preferred_element_type=jnp.float32)
            + fc_b_ref[...]
        )

    return kernel


def cuisine_rnn_forward(x, params, layer_dim):
    """x: (batch, seq, emb) [batch_first, like PyTorch]. Returns (fc_out, hn)."""
    batch, seq, emb = x.shape
    hidden = params["fc_w_t"].shape[0]
    p0 = params["rnn"][0]

    # Layer-0 input projection for the whole sequence as one big matmul in plain XLA
    # (non-recurrent work hoisted off the sequential chain); bias folded in.
    # Output is time-major (seq, batch, hidden).
    proj0_f = jnp.einsum("bsi,ih->sbh", x, p0["w_ih_f"]) + p0["b_f"]
    proj0_b = jnp.einsum("bsi,ih->sbh", x, p0["w_ih_b"]) + p0["b_b"]

    args = [proj0_f, proj0_b, p0["w_hh_f"], p0["w_hh_b"]]
    for l in range(1, layer_dim):
        p = params["rnn"][l]
        args += [p["w_ih_f"], p["w_hh_f"], p["b_f"],
                 p["w_ih_b"], p["w_hh_b"], p["b_b"]]
    args += [params["fc_w_t"], params["fc_b"]]

    kernel = make_fused_kernel(layer_dim, seq, batch, hidden)
    fc_out, hn = pl.pallas_call(
        kernel,
        out_shape=(
            jax.ShapeDtypeStruct((batch, emb), jnp.float32),
            jax.ShapeDtypeStruct((2 * layer_dim, batch, hidden), jnp.float32),
        ),
    )(*args)
    return fc_out, hn


# ---------------------------------------------------------------------------
# Pure-JAX reference (for correctness check)
# ---------------------------------------------------------------------------
def _rnn_dir_ref(x_tm, w_ih, w_hh, b):
    seq, batch, _ = x_tm.shape
    hidden = w_ih.shape[1]
    h = jnp.zeros((batch, hidden), jnp.float32)
    outs = []
    for t in range(seq):
        h = jnp.maximum(x_tm[t] @ w_ih + h @ w_hh + b, 0.0)
        outs.append(h)
    return jnp.stack(outs, 0), h


def cuisine_rnn_ref(x, params, layer_dim):
    x_tm = jnp.transpose(x, (1, 0, 2))
    hn_list = []
    layer_in = x_tm
    for l in range(layer_dim):
        p = params["rnn"][l]
        out_f, h_f = _rnn_dir_ref(layer_in, p["w_ih_f"], p["w_hh_f"], p["b_f"])
        out_b_rev, h_b = _rnn_dir_ref(layer_in[::-1], p["w_ih_b"], p["w_hh_b"], p["b_b"])
        out_b = out_b_rev[::-1]
        hn_list.append(h_f)
        hn_list.append(h_b)
        layer_in = jnp.concatenate([out_f, out_b], axis=-1)
    hn = jnp.stack(hn_list, axis=0)
    fc_out = hn[-1] @ params["fc_w_t"] + params["fc_b"]
    return fc_out, hn


# ---------------------------------------------------------------------------
# Deterministic parameter init (PyTorch-style U(-1/sqrt(H), 1/sqrt(H)))
# ---------------------------------------------------------------------------
def init_params(key, embedding_size, hidden_dim, layer_dim):
    bound = 1.0 / math.sqrt(hidden_dim)

    def u(k, shape):
        return jax.random.uniform(k, shape, jnp.float32, -bound, bound)

    params = {"rnn": []}
    for l in range(layer_dim):
        in_dim = embedding_size if l == 0 else 2 * hidden_dim
        key, *ks = jax.random.split(key, 9)
        layer = {
            # pre-transposed: (in_dim, hidden) / (hidden, hidden)
            "w_ih_f": u(ks[0], (in_dim, hidden_dim)),
            "w_hh_f": u(ks[1], (hidden_dim, hidden_dim)),
            "b_f": u(ks[2], (1, hidden_dim)) + u(ks[3], (1, hidden_dim)),  # b_ih + b_hh
            "w_ih_b": u(ks[4], (in_dim, hidden_dim)),
            "w_hh_b": u(ks[5], (hidden_dim, hidden_dim)),
            "b_b": u(ks[6], (1, hidden_dim)) + u(ks[7], (1, hidden_dim)),
        }
        params["rnn"].append(layer)
    key, kw, kb = jax.random.split(key, 3)
    params["fc_w_t"] = u(kw, (hidden_dim, embedding_size))  # (hidden, emb) = W^T
    params["fc_b"] = u(kb, (1, embedding_size))
    return params


if __name__ == "__main__":
    embedding_size = 16
    hidden_dim = 32
    layer_dim = 2
    batch = 8      # multiple of 8 => full MXU/sublane rows for the recurrent dot
    seq = 8

    key = jax.random.PRNGKey(0)
    k_x, k_p = jax.random.split(key)
    x = jax.random.normal(k_x, (batch, seq, embedding_size), jnp.float32)
    params = init_params(k_p, embedding_size, hidden_dim, layer_dim)

    fwd = jax.jit(cuisine_rnn_forward, static_argnums=2)
    fc_out, hn = fwd(x, params, layer_dim)
    jax.block_until_ready(fc_out)
    jax.block_until_ready(hn)

    # shape checks (match PyTorch: fc_out (B, E), hn (2*L, B, H))
    assert fc_out.shape == (batch, embedding_size)
    assert hn.shape == (2 * layer_dim, batch, hidden_dim)

    # numerical check against pure-JAX reference
    fc_ref, hn_ref = cuisine_rnn_ref(x, params, layer_dim)
    assert jnp.allclose(fc_out, fc_ref, rtol=1e-2, atol=1e-2)
    assert jnp.allclose(hn, hn_ref, rtol=1e-2, atol=1e-2)

    print("KERNEL_OK")
</pallas_src>

<mosaic_0001>
module attributes {stable_mosaic.version = 11 : i64} {
  func.func @kernel(%arg0: memref<8x8x32xf32, #tpu.memory_space<vmem>>, %arg1: memref<8x8x32xf32, #tpu.memory_space<vmem>>, %arg2: memref<32x32xf32, #tpu.memory_space<vmem>>, %arg3: memref<32x32xf32, #tpu.memory_space<vmem>>, %arg4: memref<64x32xf32, #tpu.memory_space<vmem>>, %arg5: memref<32x32xf32, #tpu.memory_space<vmem>>, %arg6: memref<1x32xf32, #tpu.memory_space<vmem>>, %arg7: memref<64x32xf32, #tpu.memory_space<vmem>>, %arg8: memref<32x32xf32, #tpu.memory_space<vmem>>, %arg9: memref<1x32xf32, #tpu.memory_space<vmem>>, %arg10: memref<32x16xf32, #tpu.memory_space<vmem>>, %arg11: memref<1x16xf32, #tpu.memory_space<vmem>>, %arg12: memref<8x16xf32, #tpu.memory_space<vmem>>, %arg13: memref<4x8x32xf32, #tpu.memory_space<vmem>>) attributes {dimension_semantics = [], scalar_prefetch = 0 : i64, scratch_operands = 0 : i64, tpu.core_type = #tpu.core_type<tc>} {
    %c0 = arith.constant 0 : index
    %c0_0 = arith.constant 0 : index
    %c0_1 = arith.constant 0 : index
    %0 = vector.load %arg0[%c0, %c0_0, %c0_1] : memref<8x8x32xf32, #tpu.memory_space<vmem>>, vector<1x8x32xf32>
    %1 = vector.shape_cast %0 : vector<1x8x32xf32> to vector<8x32xf32>
    %c1 = arith.constant 1 : index
    %c0_2 = arith.constant 0 : index
    %c0_3 = arith.constant 0 : index
    %2 = vector.load %arg0[%c1, %c0_2, %c0_3] : memref<8x8x32xf32, #tpu.memory_space<vmem>>, vector<1x8x32xf32>
    %3 = vector.shape_cast %2 : vector<1x8x32xf32> to vector<8x32xf32>
    %c2 = arith.constant 2 : index
    %c0_4 = arith.constant 0 : index
    %c0_5 = arith.constant 0 : index
    %4 = vector.load %arg0[%c2, %c0_4, %c0_5] : memref<8x8x32xf32, #tpu.memory_space<vmem>>, vector<1x8x32xf32>
    %5 = vector.shape_cast %4 : vector<1x8x32xf32> to vector<8x32xf32>
    %c3 = arith.constant 3 : index
    %c0_6 = arith.constant 0 : index
    %c0_7 = arith.constant 0 : index
    %6 = vector.load %arg0[%c3, %c0_6, %c0_7] : memref<8x8x32xf32, #tpu.memory_space<vmem>>, vector<1x8x32xf32>
    %7 = vector.shape_cast %6 : vector<1x8x32xf32> to vector<8x32xf32>
    %c4 = arith.constant 4 : index
    %c0_8 = arith.constant 0 : index
    %c0_9 = arith.constant 0 : index
    %8 = vector.load %arg0[%c4, %c0_8, %c0_9] : memref<8x8x32xf32, #tpu.memory_space<vmem>>, vector<1x8x32xf32>
    %9 = vector.shape_cast %8 : vector<1x8x32xf32> to vector<8x32xf32>
    %c5 = arith.constant 5 : index
    %c0_10 = arith.constant 0 : index
    %c0_11 = arith.constant 0 : index
    %10 = vector.load %arg0[%c5, %c0_10, %c0_11] : memref<8x8x32xf32, #tpu.memory_space<vmem>>, vector<1x8x32xf32>
    %11 = vector.shape_cast %10 : vector<1x8x32xf32> to vector<8x32xf32>
    %c6 = arith.constant 6 : index
    %c0_12 = arith.constant 0 : index
    %c0_13 = arith.constant 0 : index
    %12 = vector.load %arg0[%c6, %c0_12, %c0_13] : memref<8x8x32xf32, #tpu.memory_space<vmem>>, vector<1x8x32xf32>
    %13 = vector.shape_cast %12 : vector<1x8x32xf32> to vector<8x32xf32>
    %c7 = arith.constant 7 : index
    %c0_14 = arith.constant 0 : index
    %c0_15 = arith.constant 0 : index
    %14 = vector.load %arg0[%c7, %c0_14, %c0_15] : memref<8x8x32xf32, #tpu.memory_space<vmem>>, vector<1x8x32xf32>
    %15 = vector.shape_cast %14 : vector<1x8x32xf32> to vector<8x32xf32>
    %c0_16 = arith.constant 0 : index
    %c0_17 = arith.constant 0 : index
    %c0_18 = arith.constant 0 : index
    %16 = vector.load %arg1[%c0_16, %c0_17, %c0_18] : memref<8x8x32xf32, #tpu.memory_space<vmem>>, vector<1x8x32xf32>
    %17 = vector.shape_cast %16 : vector<1x8x32xf32> to vector<8x32xf32>
    %c1_19 = arith.constant 1 : index
    %c0_20 = arith.constant 0 : index
    %c0_21 = arith.constant 0 : index
    %18 = vector.load %arg1[%c1_19, %c0_20, %c0_21] : memref<8x8x32xf32, #tpu.memory_space<vmem>>, vector<1x8x32xf32>
    %19 = vector.shape_cast %18 : vector<1x8x32xf32> to vector<8x32xf32>
    %c2_22 = arith.constant 2 : index
    %c0_23 = arith.constant 0 : index
    %c0_24 = arith.constant 0 : index
    %20 = vector.load %arg1[%c2_22, %c0_23, %c0_24] : memref<8x8x32xf32, #tpu.memory_space<vmem>>, vector<1x8x32xf32>
    %21 = vector.shape_cast %20 : vector<1x8x32xf32> to vector<8x32xf32>
    %c3_25 = arith.constant 3 : index
    %c0_26 = arith.constant 0 : index
    %c0_27 = arith.constant 0 : index
    %22 = vector.load %arg1[%c3_25, %c0_26, %c0_27] : memref<8x8x32xf32, #tpu.memory_space<vmem>>, vector<1x8x32xf32>
    %23 = vector.shape_cast %22 : vector<1x8x32xf32> to vector<8x32xf32>
    %c4_28 = arith.constant 4 : index
    %c0_29 = arith.constant 0 : index
    %c0_30 = arith.constant 0 : index
    %24 = vector.load %arg1[%c4_28, %c0_29, %c0_30] : memref<8x8x32xf32, #tpu.memory_space<vmem>>, vector<1x8x32xf32>
    %25 = vector.shape_cast %24 : vector<1x8x32xf32> to vector<8x32xf32>
    %c5_31 = arith.constant 5 : index
    %c0_32 = arith.constant 0 : index
    %c0_33 = arith.constant 0 : index
    %26 = vector.load %arg1[%c5_31, %c0_32, %c0_33] : memref<8x8x32xf32, #tpu.memory_space<vmem>>, vector<1x8x32xf32>
    %27 = vector.shape_cast %26 : vector<1x8x32xf32> to vector<8x32xf32>
    %c6_34 = arith.constant 6 : index
    %c0_35 = arith.constant 0 : index
    %c0_36 = arith.constant 0 : index
    %28 = vector.load %arg1[%c6_34, %c0_35, %c0_36] : memref<8x8x32xf32, #tpu.memory_space<vmem>>, vector<1x8x32xf32>
    %29 = vector.shape_cast %28 : vector<1x8x32xf32> to vector<8x32xf32>
    %c7_37 = arith.constant 7 : index
    %c0_38 = arith.constant 0 : index
    %c0_39 = arith.constant 0 : index
    %30 = vector.load %arg1[%c7_37, %c0_38, %c0_39] : memref<8x8x32xf32, #tpu.memory_space<vmem>>, vector<1x8x32xf32>
    %31 = vector.shape_cast %30 : vector<1x8x32xf32> to vector<8x32xf32>
    %c0_40 = arith.constant 0 : index
    %c0_41 = arith.constant 0 : index
    %32 = vector.load %arg2[%c0_40, %c0_41] : memref<32x32xf32, #tpu.memory_space<vmem>>, vector<32x32xf32>
    %cst = arith.constant 0.000000e+00 : f32
    %33 = vector.broadcast %cst : f32 to vector<8x32xf32>
    %cst_42 = arith.constant dense<0.000000e+00> : vector<8x32xf32>
    %34 = tpu.matmul %33, %32, %cst_42 {dimension_numbers = #tpu.dot_dimension_numbers<[1], [0], [0], [1], [0, 0, 1, 1], [], []>} : vector<8x32xf32>, vector<32x32xf32>, vector<8x32xf32> -> vector<8x32xf32>
    %35 = arith.addf %1, %34 : vector<8x32xf32>
    %cst_43 = arith.constant 0.000000e+00 : f32
    %36 = vector.broadcast %cst_43 : f32 to vector<8x32xf32>
    %37 = arith.maximumf %35, %36 : vector<8x32xf32>
    %cst_44 = arith.constant dense<0.000000e+00> : vector<8x32xf32>
    %38 = tpu.matmul %37, %32, %cst_44 {dimension_numbers = #tpu.dot_dimension_numbers<[1], [0], [0], [1], [0, 0, 1, 1], [], []>} : vector<8x32xf32>, vector<32x32xf32>, vector<8x32xf32> -> vector<8x32xf32>
    %39 = arith.addf %3, %38 : vector<8x32xf32>
    %cst_45 = arith.constant 0.000000e+00 : f32
    %40 = vector.broadcast %cst_45 : f32 to vector<8x32xf32>
    %41 = arith.maximumf %39, %40 : vector<8x32xf32>
    %cst_46 = arith.constant dense<0.000000e+00> : vector<8x32xf32>
    %42 = tpu.matmul %41, %32, %cst_46 {dimension_numbers = #tpu.dot_dimension_numbers<[1], [0], [0], [1], [0, 0, 1, 1], [], []>} : vector<8x32xf32>, vector<32x32xf32>, vector<8x32xf32> -> vector<8x32xf32>
    %43 = arith.addf %5, %42 : vector<8x32xf32>
    %cst_47 = arith.constant 0.000000e+00 : f32
    %44 = vector.broadcast %cst_47 : f32 to vector<8x32xf32>
    %45 = arith.maximumf %43, %44 : vector<8x32xf32>
    %cst_48 = arith.constant dense<0.000000e+00> : vector<8x32xf32>
    %46 = tpu.matmul %45, %32, %cst_48 {dimension_numbers = #tpu.dot_dimension_numbers<[1], [0], [0], [1], [0, 0, 1, 1], [], []>} : vector<8x32xf32>, vector<32x32xf32>, vector<8x32xf32> -> vector<8x32xf32>
    %47 = arith.addf %7, %46 : vector<8x32xf32>
    %cst_49 = arith.constant 0.000000e+00 : f32
    %48 = vector.broadcast %cst_49 : f32 to vector<8x32xf32>
    %49 = arith.maximumf %47, %48 : vector<8x32xf32>
    %cst_50 = arith.constant dense<0.000000e+00> : vector<8x32xf32>
    %50 = tpu.matmul %49, %32, %cst_50 {dimension_numbers = #tpu.dot_dimension_numbers<[1], [0], [0], [1], [0, 0, 1, 1], [], []>} : vector<8x32xf32>, vector<32x32xf32>, vector<8x32xf32> -> vector<8x32xf32>
    %51 = arith.addf %9, %50 : vector<8x32xf32>
    %cst_51 = arith.constant 0.000000e+00 : f32
    %52 = vector.broadcast %cst_51 : f32 to vector<8x32xf32>
    %53 = arith.maximumf %51, %52 : vector<8x32xf32>
    %cst_52 = arith.constant dense<0.000000e+00> : vector<8x32xf32>
    %54 = tpu.matmul %53, %32, %cst_52 {dimension_numbers = #tpu.dot_dimension_numbers<[1], [0], [0], [1], [0, 0, 1, 1], [], []>} : vector<8x32xf32>, vector<32x32xf32>, vector<8x32xf32> -> vector<8x32xf32>
    %55 = arith.addf %11, %54 : vector<8x32xf32>
    %cst_53 = arith.constant 0.000000e+00 : f32
    %56 = vector.broadcast %cst_53 : f32 to vector<8x32xf32>
    %57 = arith.maximumf %55, %56 : vector<8x32xf32>
    %cst_54 = arith.constant dense<0.000000e+00> : vector<8x32xf32>
    %58 = tpu.matmul %57, %32, %cst_54 {dimension_numbers = #tpu.dot_dimension_numbers<[1], [0], [0], [1], [0, 0, 1, 1], [], []>} : vector<8x32xf32>, vector<32x32xf32>, vector<8x32xf32> -> vector<8x32xf32>
    %59 = arith.addf %13, %58 : vector<8x32xf32>
    %cst_55 = arith.constant 0.000000e+00 : f32
    %60 = vector.broadcast %cst_55 : f32 to vector<8x32xf32>
    %61 = arith.maximumf %59, %60 : vector<8x32xf32>
    %cst_56 = arith.constant dense<0.000000e+00> : vector<8x32xf32>
    %62 = tpu.matmul %61, %32, %cst_56 {dimension_numbers = #tpu.dot_dimension_numbers<[1], [0], [0], [1], [0, 0, 1, 1], [], []>} : vector<8x32xf32>, vector<32x32xf32>, vector<8x32xf32> -> vector<8x32xf32>
    %63 = arith.addf %15, %62 : vector<8x32xf32>
    %cst_57 = arith.constant 0.000000e+00 : f32
    %64 = vector.broadcast %cst_57 : f32 to vector<8x32xf32>
    %65 = arith.maximumf %63, %64 : vector<8x32xf32>
    %c0_58 = arith.constant 0 : index
    %c0_59 = arith.constant 0 : index
    %66 = vector.load %arg3[%c0_58, %c0_59] : memref<32x32xf32, #tpu.memory_space<vmem>>, vector<32x32xf32>
    %cst_60 = arith.constant 0.000000e+00 : f32
    %67 = vector.broadcast %cst_60 : f32 to vector<8x32xf32>
    %cst_61 = arith.constant dense<0.000000e+00> : vector<8x32xf32>
    %68 = tpu.matmul %67, %66, %cst_61 {dimension_numbers = #tpu.dot_dimension_numbers<[1], [0], [0], [1], [0, 0, 1, 1], [], []>} : vector<8x32xf32>, vector<32x32xf32>, vector<8x32xf32> -> vector<8x32xf32>
    %69 = arith.addf %31, %68 : vector<8x32xf32>
    %cst_62 = arith.constant 0.000000e+00 : f32
    %70 = vector.broadcast %cst_62 : f32 to vector<8x32xf32>
    %71 = arith.maximumf %69, %70 : vector<8x32xf32>
    %cst_63 = arith.constant dense<0.000000e+00> : vector<8x32xf32>
    %72 = tpu.matmul %71, %66, %cst_63 {dimension_numbers = #tpu.dot_dimension_numbers<[1], [0], [0], [1], [0, 0, 1, 1], [], []>} : vector<8x32xf32>, vector<32x32xf32>, vector<8x32xf32> -> vector<8x32xf32>
    %73 = arith.addf %29, %72 : vector<8x32xf32>
    %cst_64 = arith.constant 0.000000e+00 : f32
    %74 = vector.broadcast %cst_64 : f32 to vector<8x32xf32>
    %75 = arith.maximumf %73, %74 : vector<8x32xf32>
    %cst_65 = arith.constant dense<0.000000e+00> : vector<8x32xf32>
    %76 = tpu.matmul %75, %66, %cst_65 {dimension_numbers = #tpu.dot_dimension_numbers<[1], [0], [0], [1], [0, 0, 1, 1], [], []>} : vector<8x32xf32>, vector<32x32xf32>, vector<8x32xf32> -> vector<8x32xf32>
    %77 = arith.addf %27, %76 : vector<8x32xf32>
    %cst_66 = arith.constant 0.000000e+00 : f32
    %78 = vector.broadcast %cst_66 : f32 to vector<8x32xf32>
    %79 = arith.maximumf %77, %78 : vector<8x32xf32>
    %cst_67 = arith.constant dense<0.000000e+00> : vector<8x32xf32>
    %80 = tpu.matmul %79, %66, %cst_67 {dimension_numbers = #tpu.dot_dimension_numbers<[1], [0], [0], [1], [0, 0, 1, 1], [], []>} : vector<8x32xf32>, vector<32x32xf32>, vector<8x32xf32> -> vector<8x32xf32>
    %81 = arith.addf %25, %80 : vector<8x32xf32>
    %cst_68 = arith.constant 0.000000e+00 : f32
    %82 = vector.broadcast %cst_68 : f32 to vector<8x32xf32>
    %83 = arith.maximumf %81, %82 : vector<8x32xf32>
    %cst_69 = arith.constant dense<0.000000e+00> : vector<8x32xf32>
    %84 = tpu.matmul %83, %66, %cst_69 {dimension_numbers = #tpu.dot_dimension_numbers<[1], [0], [0], [1], [0, 0, 1, 1], [], []>} : vector<8x32xf32>, vector<32x32xf32>, vector<8x32xf32> -> vector<8x32xf32>
    %85 = arith.addf %23, %84 : vector<8x32xf32>
    %cst_70 = arith.constant 0.000000e+00 : f32
    %86 = vector.broadcast %cst_70 : f32 to vector<8x32xf32>
    %87 = arith.maximumf %85, %86 : vector<8x32xf32>
    %cst_71 = arith.constant dense<0.000000e+00> : vector<8x32xf32>
    %88 = tpu.matmul %87, %66, %cst_71 {dimension_numbers = #tpu.dot_dimension_numbers<[1], [0], [0], [1], [0, 0, 1, 1], [], []>} : vector<8x32xf32>, vector<32x32xf32>, vector<8x32xf32> -> vector<8x32xf32>
    %89 = arith.addf %21, %88 : vector<8x32xf32>
    %cst_72 = arith.constant 0.000000e+00 : f32
    %90 = vector.broadcast %cst_72 : f32 to vector<8x32xf32>
    %91 = arith.maximumf %89, %90 : vector<8x32xf32>
    %cst_73 = arith.constant dense<0.000000e+00> : vector<8x32xf32>
    %92 = tpu.matmul %91, %66, %cst_73 {dimension_numbers = #tpu.dot_dimension_numbers<[1], [0], [0], [1], [0, 0, 1, 1], [], []>} : vector<8x32xf32>, vector<32x32xf32>, vector<8x32xf32> -> vector<8x32xf32>
    %93 = arith.addf %19, %92 : vector<8x32xf32>
    %cst_74 = arith.constant 0.000000e+00 : f32
    %94 = vector.broadcast %cst_74 : f32 to vector<8x32xf32>
    %95 = arith.maximumf %93, %94 : vector<8x32xf32>
    %cst_75 = arith.constant dense<0.000000e+00> : vector<8x32xf32>
    %96 = tpu.matmul %95, %66, %cst_75 {dimension_numbers = #tpu.dot_dimension_numbers<[1], [0], [0], [1], [0, 0, 1, 1], [], []>} : vector<8x32xf32>, vector<32x32xf32>, vector<8x32xf32> -> vector<8x32xf32>
    %97 = arith.addf %17, %96 : vector<8x32xf32>
    %cst_76 = arith.constant 0.000000e+00 : f32
    %98 = vector.broadcast %cst_76 : f32 to vector<8x32xf32>
    %99 = arith.maximumf %97, %98 : vector<8x32xf32>
    %c0_77 = arith.constant 0 : index
    %c0_78 = arith.constant 0 : index
    %c0_79 = arith.constant 0 : index
    %100 = vector.load %arg13[%c0_77, %c0_78, %c0_79] : memref<4x8x32xf32, #tpu.memory_space<vmem>>, vector<1x8x32xf32>
    %101 = vector.shape_cast %100 : vector<1x8x32xf32> to vector<8x32xf32>
    %102 = vector.shape_cast %65 : vector<8x32xf32> to vector<1x8x32xf32>
    tpu.vector_store %arg13[%c0_77, %c0_78, %c0_79], %102 {strides = array<i32>} : memref<4x8x32xf32, #tpu.memory_space<vmem>>, vector<1x8x32xf32>,
    %c1_80 = arith.constant 1 : index
    %c0_81 = arith.constant 0 : index
    %c0_82 = arith.constant 0 : index
    %103 = vector.load %arg13[%c1_80, %c0_81, %c0_82] : memref<4x8x32xf32, #tpu.memory_space<vmem>>, vector<1x8x32xf32>
    %104 = vector.shape_cast %103 : vector<1x8x32xf32> to vector<8x32xf32>
    %105 = vector.shape_cast %99 : vector<8x32xf32> to vector<1x8x32xf32>
    tpu.vector_store %arg13[%c1_80, %c0_81, %c0_82], %105 {strides = array<i32>} : memref<4x8x32xf32, #tpu.memory_space<vmem>>, vector<1x8x32xf32>,
    %106 = tpu.concatenate %37, %99 in 1 : vector<8x32xf32>, vector<8x32xf32> -> vector<8x64xf32>
    %107 = tpu.concatenate %41, %95 in 1 : vector<8x32xf32>, vector<8x32xf32> -> vector<8x64xf32>
    %108 = tpu.concatenate %45, %91 in 1 : vector<8x32xf32>, vector<8x32xf32> -> vector<8x64xf32>
    %109 = tpu.concatenate %49, %87 in 1 : vector<8x32xf32>, vector<8x32xf32> -> vector<8x64xf32>
    %110 = tpu.concatenate %53, %83 in 1 : vector<8x32xf32>, vector<8x32xf32> -> vector<8x64xf32>
    %111 = tpu.concatenate %57, %79 in 1 : vector<8x32xf32>, vector<8x32xf32> -> vector<8x64xf32>
    %112 = tpu.concatenate %61, %75 in 1 : vector<8x32xf32>, vector<8x32xf32> -> vector<8x64xf32>
    %113 = tpu.concatenate %65, %71 in 1 : vector<8x32xf32>, vector<8x32xf32> -> vector<8x64xf32>
    %c0_83 = arith.constant 0 : index
    %c0_84 = arith.constant 0 : index
    %114 = vector.load %arg4[%c0_83, %c0_84] : memref<64x32xf32, #tpu.memory_space<vmem>>, vector<64x32xf32>
    %c0_85 = arith.constant 0 : index
    %c0_86 = arith.constant 0 : index
    %115 = vector.load %arg6[%c0_85, %c0_86] : memref<1x32xf32, #tpu.memory_space<vmem>>, vector<1x32xf32>
    %c0_87 = arith.constant 0 : index
    %c0_88 = arith.constant 0 : index
    %116 = vector.load %arg7[%c0_87, %c0_88] : memref<64x32xf32, #tpu.memory_space<vmem>>, vector<64x32xf32>
    %c0_89 = arith.constant 0 : index
    %c0_90 = arith.constant 0 : index
    %117 = vector.load %arg9[%c0_89, %c0_90] : memref<1x32xf32, #tpu.memory_space<vmem>>, vector<1x32xf32>
    %cst_91 = arith.constant dense<0.000000e+00> : vector<8x32xf32>
    %118 = tpu.matmul %106, %114, %cst_91 {dimension_numbers = #tpu.dot_dimension_numbers<[1], [0], [0], [1], [0, 0, 1, 1], [], []>} : vector<8x64xf32>, vector<64x32xf32>, vector<8x32xf32> -> vector<8x32xf32>
    %119 = vector.broadcast %115 : vector<1x32xf32> to vector<8x32xf32>
    %120 = arith.addf %118, %119 : vector<8x32xf32>
    %cst_92 = arith.constant dense<0.000000e+00> : vector<8x32xf32>
    %121 = tpu.matmul %107, %114, %cst_92 {dimension_numbers = #tpu.dot_dimension_numbers<[1], [0], [0], [1], [0, 0, 1, 1], [], []>} : vector<8x64xf32>, vector<64x32xf32>, vector<8x32xf32> -> vector<8x32xf32>
    %122 = vector.broadcast %115 : vector<1x32xf32> to vector<8x32xf32>
    %123 = arith.addf %121, %122 : vector<8x32xf32>
    %cst_93 = arith.constant dense<0.000000e+00> : vector<8x32xf32>
    %124 = tpu.matmul %108, %114, %cst_93 {dimension_numbers = #tpu.dot_dimension_numbers<[1], [0], [0], [1], [0, 0, 1, 1], [], []>} : vector<8x64xf32>, vector<64x32xf32>, vector<8x32xf32> -> vector<8x32xf32>
    %125 = vector.broadcast %115 : vector<1x32xf32> to vector<8x32xf32>
    %126 = arith.addf %124, %125 : vector<8x32xf32>
    %cst_94 = arith.constant dense<0.000000e+00> : vector<8x32xf32>
    %127 = tpu.matmul %109, %114, %cst_94 {dimension_numbers = #tpu.dot_dimension_numbers<[1], [0], [0], [1], [0, 0, 1, 1], [], []>} : vector<8x64xf32>, vector<64x32xf32>, vector<8x32xf32> -> vector<8x32xf32>
    %128 = vector.broadcast %115 : vector<1x32xf32> to vector<8x32xf32>
    %129 = arith.addf %127, %128 : vector<8x32xf32>
    %cst_95 = arith.constant dense<0.000000e+00> : vector<8x32xf32>
    %130 = tpu.matmul %110, %114, %cst_95 {dimension_numbers = #tpu.dot_dimension_numbers<[1], [0], [0], [1], [0, 0, 1, 1], [], []>} : vector<8x64xf32>, vector<64x32xf32>, vector<8x32xf32> -> vector<8x32xf32>
    %131 = vector.broadcast %115 : vector<1x32xf32> to vector<8x32xf32>
    %132 = arith.addf %130, %131 : vector<8x32xf32>
    %cst_96 = arith.constant dense<0.000000e+00> : vector<8x32xf32>
    %133 = tpu.matmul %111, %114, %cst_96 {dimension_numbers = #tpu.dot_dimension_numbers<[1], [0], [0], [1], [0, 0, 1, 1], [], []>} : vector<8x64xf32>, vector<64x32xf32>, vector<8x32xf32> -> vector<8x32xf32>
    %134 = vector.broadcast %115 : vector<1x32xf32> to vector<8x32xf32>
    %135 = arith.addf %133, %134 : vector<8x32xf32>
    %cst_97 = arith.constant dense<0.000000e+00> : vector<8x32xf32>
    %136 = tpu.matmul %112, %114, %cst_97 {dimension_numbers = #tpu.dot_dimension_numbers<[1], [0], [0], [1], [0, 0, 1, 1], [], []>} : vector<8x64xf32>, vector<64x32xf32>, vector<8x32xf32> -> vector<8x32xf32>
    %137 = vector.broadcast %115 : vector<1x32xf32> to vector<8x32xf32>
    %138 = arith.addf %136, %137 : vector<8x32xf32>
    %cst_98 = arith.constant dense<0.000000e+00> : vector<8x32xf32>
    %139 = tpu.matmul %113, %114, %cst_98 {dimension_numbers = #tpu.dot_dimension_numbers<[1], [0], [0], [1], [0, 0, 1, 1], [], []>} : vector<8x64xf32>, vector<64x32xf32>, vector<8x32xf32> -> vector<8x32xf32>
    %140 = vector.broadcast %115 : vector<1x32xf32> to vector<8x32xf32>
    %141 = arith.addf %139, %140 : vector<8x32xf32>
    %cst_99 = arith.constant dense<0.000000e+00> : vector<8x32xf32>
    %142 = tpu.matmul %106, %116, %cst_99 {dimension_numbers = #tpu.dot_dimension_numbers<[1], [0], [0], [1], [0, 0, 1, 1], [], []>} : vector<8x64xf32>, vector<64x32xf32>, vector<8x32xf32> -> vector<8x32xf32>
    %143 = vector.broadcast %117 : vector<1x32xf32> to vector<8x32xf32>
    %144 = arith.addf %142, %143 : vector<8x32xf32>
    %cst_100 = arith.constant dense<0.000000e+00> : vector<8x32xf32>
    %145 = tpu.matmul %107, %116, %cst_100 {dimension_numbers = #tpu.dot_dimension_numbers<[1], [0], [0], [1], [0, 0, 1, 1], [], []>} : vector<8x64xf32>, vector<64x32xf32>, vector<8x32xf32> -> vector<8x32xf32>
    %146 = vector.broadcast %117 : vector<1x32xf32> to vector<8x32xf32>
    %147 = arith.addf %145, %146 : vector<8x32xf32>
    %cst_101 = arith.constant dense<0.000000e+00> : vector<8x32xf32>
    %148 = tpu.matmul %108, %116, %cst_101 {dimension_numbers = #tpu.dot_dimension_numbers<[1], [0], [0], [1], [0, 0, 1, 1], [], []>} : vector<8x64xf32>, vector<64x32xf32>, vector<8x32xf32> -> vector<8x32xf32>
    %149 = vector.broadcast %117 : vector<1x32xf32> to vector<8x32xf32>
    %150 = arith.addf %148, %149 : vector<8x32xf32>
    %cst_102 = arith.constant dense<0.000000e+00> : vector<8x32xf32>
    %151 = tpu.matmul %109, %116, %cst_102 {dimension_numbers = #tpu.dot_dimension_numbers<[1], [0], [0], [1], [0, 0, 1, 1], [], []>} : vector<8x64xf32>, vector<64x32xf32>, vector<8x32xf32> -> vector<8x32xf32>
    %152 = vector.broadcast %117 : vector<1x32xf32> to vector<8x32xf32>
    %153 = arith.addf %151, %152 : vector<8x32xf32>
    %cst_103 = arith.constant dense<0.000000e+00> : vector<8x32xf32>
    %154 = tpu.matmul %110, %116, %cst_103 {dimension_numbers = #tpu.dot_dimension_numbers<[1], [0], [0], [1], [0, 0, 1, 1], [], []>} : vector<8x64xf32>, vector<64x32xf32>, vector<8x32xf32> -> vector<8x32xf32>
    %155 = vector.broadcast %117 : vector<1x32xf32> to vector<8x32xf32>
    %156 = arith.addf %154, %155 : vector<8x32xf32>
    %cst_104 = arith.constant dense<0.000000e+00> : vector<8x32xf32>
    %157 = tpu.matmul %111, %116, %cst_104 {dimension_numbers = #tpu.dot_dimension_numbers<[1], [0], [0], [1], [0, 0, 1, 1], [], []>} : vector<8x64xf32>, vector<64x32xf32>, vector<8x32xf32> -> vector<8x32xf32>
    %158 = vector.broadcast %117 : vector<1x32xf32> to vector<8x32xf32>
    %159 = arith.addf %157, %158 : vector<8x32xf32>
    %cst_105 = arith.constant dense<0.000000e+00> : vector<8x32xf32>
    %160 = tpu.matmul %112, %116, %cst_105 {dimension_numbers = #tpu.dot_dimension_numbers<[1], [0], [0], [1], [0, 0, 1, 1], [], []>} : vector<8x64xf32>, vector<64x32xf32>, vector<8x32xf32> -> vector<8x32xf32>
    %161 = vector.broadcast %117 : vector<1x32xf32> to vector<8x32xf32>
    %162 = arith.addf %160, %161 : vector<8x32xf32>
    %cst_106 = arith.constant dense<0.000000e+00> : vector<8x32xf32>
    %163 = tpu.matmul %113, %116, %cst_106 {dimension_numbers = #tpu.dot_dimension_numbers<[1], [0], [0], [1], [0, 0, 1, 1], [], []>} : vector<8x64xf32>, vector<64x32xf32>, vector<8x32xf32> -> vector<8x32xf32>
    %164 = vector.broadcast %117 : vector<1x32xf32> to vector<8x32xf32>
    %165 = arith.addf %163, %164 : vector<8x32xf32>
    %c0_107 = arith.constant 0 : index
    %c0_108 = arith.constant 0 : index
    %166 = vector.load %arg5[%c0_107, %c0_108] : memref<32x32xf32, #tpu.memory_space<vmem>>, vector<32x32xf32>
    %cst_109 = arith.constant 0.000000e+00 : f32
    %167 = vector.broadcast %cst_109 : f32 to vector<8x32xf32>
    %cst_110 = arith.constant dense<0.000000e+00> : vector<8x32xf32>
    %168 = tpu.matmul %167, %166, %cst_110 {dimension_numbers = #tpu.dot_dimension_numbers<[1], [0], [0], [1], [0, 0, 1, 1], [], []>} : vector<8x32xf32>, vector<32x32xf32>, vector<8x32xf32> -> vector<8x32xf32>
    %169 = arith.addf %120, %168 : vector<8x32xf32>
    %cst_111 = arith.constant 0.000000e+00 : f32
    %170 = vector.broadcast %cst_111 : f32 to vector<8x32xf32>
    %171 = arith.maximumf %169, %170 : vector<8x32xf32>
    %cst_112 = arith.constant dense<0.000000e+00> : vector<8x32xf32>
    %172 = tpu.matmul %171, %166, %cst_112 {dimension_numbers = #tpu.dot_dimension_numbers<[1], [0], [0], [1], [0, 0, 1, 1], [], []>} : vector<8x32xf32>, vector<32x32xf32>, vector<8x32xf32> -> vector<8x32xf32>
    %173 = arith.addf %123, %172 : vector<8x32xf32>
    %cst_113 = arith.constant 0.000000e+00 : f32
    %174 = vector.broadcast %cst_113 : f32 to vector<8x32xf32>
    %175 = arith.maximumf %173, %174 : vector<8x32xf32>
    %cst_114 = arith.constant dense<0.000000e+00> : vector<8x32xf32>
    %176 = tpu.matmul %175, %166, %cst_114 {dimension_numbers = #tpu.dot_dimension_numbers<[1], [0], [0], [1], [0, 0, 1, 1], [], []>} : vector<8x32xf32>, vector<32x32xf32>, vector<8x32xf32> -> vector<8x32xf32>
    %177 = arith.addf %126, %176 : vector<8x32xf32>
    %cst_115 = arith.constant 0.000000e+00 : f32
    %178 = vector.broadcast %cst_115 : f32 to vector<8x32xf32>
    %179 = arith.maximumf %177, %178 : vector<8x32xf32>
    %cst_116 = arith.constant dense<0.000000e+00> : vector<8x32xf32>
    %180 = tpu.matmul %179, %166, %cst_116 {dimension_numbers = #tpu.dot_dimension_numbers<[1], [0], [0], [1], [0, 0, 1, 1], [], []>} : vector<8x32xf32>, vector<32x32xf32>, vector<8x32xf32> -> vector<8x32xf32>
    %181 = arith.addf %129, %180 : vector<8x32xf32>
    %cst_117 = arith.constant 0.000000e+00 : f32
    %182 = vector.broadcast %cst_117 : f32 to vector<8x32xf32>
    %183 = arith.maximumf %181, %182 : vector<8x32xf32>
    %cst_118 = arith.constant dense<0.000000e+00> : vector<8x32xf32>
    %184 = tpu.matmul %183, %166, %cst_118 {dimension_numbers = #tpu.dot_dimension_numbers<[1], [0], [0], [1], [0, 0, 1, 1], [], []>} : vector<8x32xf32>, vector<32x32xf32>, vector<8x32xf32> -> vector<8x32xf32>
    %185 = arith.addf %132, %184 : vector<8x32xf32>
    %cst_119 = arith.constant 0.000000e+00 : f32
    %186 = vector.broadcast %cst_119 : f32 to vector<8x32xf32>
    %187 = arith.maximumf %185, %186 : vector<8x32xf32>
    %cst_120 = arith.constant dense<0.000000e+00> : vector<8x32xf32>
    %188 = tpu.matmul %187, %166, %cst_120 {dimension_numbers = #tpu.dot_dimension_numbers<[1], [0], [0], [1], [0, 0, 1, 1], [], []>} : vector<8x32xf32>, vector<32x32xf32>, vector<8x32xf32> -> vector<8x32xf32>
    %189 = arith.addf %135, %188 : vector<8x32xf32>
    %cst_121 = arith.constant 0.000000e+00 : f32
    %190 = vector.broadcast %cst_121 : f32 to vector<8x32xf32>
    %191 = arith.maximumf %189, %190 : vector<8x32xf32>
    %cst_122 = arith.constant dense<0.000000e+00> : vector<8x32xf32>
    %192 = tpu.matmul %191, %166, %cst_122 {dimension_numbers = #tpu.dot_dimension_numbers<[1], [0], [0], [1], [0, 0, 1, 1], [], []>} : vector<8x32xf32>, vector<32x32xf32>, vector<8x32xf32> -> vector<8x32xf32>
    %193 = arith.addf %138, %192 : vector<8x32xf32>
    %cst_123 = arith.constant 0.000000e+00 : f32
    %194 = vector.broadcast %cst_123 : f32 to vector<8x32xf32>
    %195 = arith.maximumf %193, %194 : vector<8x32xf32>
    %cst_124 = arith.constant dense<0.000000e+00> : vector<8x32xf32>
    %196 = tpu.matmul %195, %166, %cst_124 {dimension_numbers = #tpu.dot_dimension_numbers<[1], [0], [0], [1], [0, 0, 1, 1], [], []>} : vector<8x32xf32>, vector<32x32xf32>, vector<8x32xf32> -> vector<8x32xf32>
    %197 = arith.addf %141, %196 : vector<8x32xf32>
    %cst_125 = arith.constant 0.000000e+00 : f32
    %198 = vector.broadcast %cst_125 : f32 to vector<8x32xf32>
    %199 = arith.maximumf %197, %198 : vector<8x32xf32>
    %c0_126 = arith.constant 0 : index
    %c0_127 = arith.constant 0 : index
    %200 = vector.load %arg8[%c0_126, %c0_127] : memref<32x32xf32, #tpu.memory_space<vmem>>, vector<32x32xf32>
    %cst_128 = arith.constant 0.000000e+00 : f32
    %201 = vector.broadcast %cst_128 : f32 to vector<8x32xf32>
    %cst_129 = arith.constant dense<0.000000e+00> : vector<8x32xf32>
    %202 = tpu.matmul %201, %200, %cst_129 {dimension_numbers = #tpu.dot_dimension_numbers<[1], [0], [0], [1], [0, 0, 1, 1], [], []>} : vector<8x32xf32>, vector<32x32xf32>, vector<8x32xf32> -> vector<8x32xf32>
    %203 = arith.addf %165, %202 : vector<8x32xf32>
    %cst_130 = arith.constant 0.000000e+00 : f32
    %204 = vector.broadcast %cst_130 : f32 to vector<8x32xf32>
    %205 = arith.maximumf %203, %204 : vector<8x32xf32>
    %cst_131 = arith.constant dense<0.000000e+00> : vector<8x32xf32>
    %206 = tpu.matmul %205, %200, %cst_131 {dimension_numbers = #tpu.dot_dimension_numbers<[1], [0], [0], [1], [0, 0, 1, 1], [], []>} : vector<8x32xf32>, vector<32x32xf32>, vector<8x32xf32> -> vector<8x32xf32>
    %207 = arith.addf %162, %206 : vector<8x32xf32>
    %cst_132 = arith.constant 0.000000e+00 : f32
    %208 = vector.broadcast %cst_132 : f32 to vector<8x32xf32>
    %209 = arith.maximumf %207, %208 : vector<8x32xf32>
    %cst_133 = arith.constant dense<0.000000e+00> : vector<8x32xf32>
    %210 = tpu.matmul %209, %200, %cst_133 {dimension_numbers = #tpu.dot_dimension_numbers<[1], [0], [0], [1], [0, 0, 1, 1], [], []>} : vector<8x32xf32>, vector<32x32xf32>, vector<8x32xf32> -> vector<8x32xf32>
    %211 = arith.addf %159, %210 : vector<8x32xf32>
    %cst_134 = arith.constant 0.000000e+00 : f32
    %212 = vector.broadcast %cst_134 : f32 to vector<8x32xf32>
    %213 = arith.maximumf %211, %212 : vector<8x32xf32>
    %cst_135 = arith.constant dense<0.000000e+00> : vector<8x32xf32>
    %214 = tpu.matmul %213, %200, %cst_135 {dimension_numbers = #tpu.dot_dimension_numbers<[1], [0], [0], [1], [0, 0, 1, 1], [], []>} : vector<8x32xf32>, vector<32x32xf32>, vector<8x32xf32> -> vector<8x32xf32>
    %215 = arith.addf %156, %214 : vector<8x32xf32>
    %cst_136 = arith.constant 0.000000e+00 : f32
    %216 = vector.broadcast %cst_136 : f32 to vector<8x32xf32>
    %217 = arith.maximumf %215, %216 : vector<8x32xf32>
    %cst_137 = arith.constant dense<0.000000e+00> : vector<8x32xf32>
    %218 = tpu.matmul %217, %200, %cst_137 {dimension_numbers = #tpu.dot_dimension_numbers<[1], [0], [0], [1], [0, 0, 1, 1], [], []>} : vector<8x32xf32>, vector<32x32xf32>, vector<8x32xf32> -> vector<8x32xf32>
    %219 = arith.addf %153, %218 : vector<8x32xf32>
    %cst_138 = arith.constant 0.000000e+00 : f32
    %220 = vector.broadcast %cst_138 : f32 to vector<8x32xf32>
    %221 = arith.maximumf %219, %220 : vector<8x32xf32>
    %cst_139 = arith.constant dense<0.000000e+00> : vector<8x32xf32>
    %222 = tpu.matmul %221, %200, %cst_139 {dimension_numbers = #tpu.dot_dimension_numbers<[1], [0], [0], [1], [0, 0, 1, 1], [], []>} : vector<8x32xf32>, vector<32x32xf32>, vector<8x32xf32> -> vector<8x32xf32>
    %223 = arith.addf %150, %222 : vector<8x32xf32>
    %cst_140 = arith.constant 0.000000e+00 : f32
    %224 = vector.broadcast %cst_140 : f32 to vector<8x32xf32>
    %225 = arith.maximumf %223, %224 : vector<8x32xf32>
    %cst_141 = arith.constant dense<0.000000e+00> : vector<8x32xf32>
    %226 = tpu.matmul %225, %200, %cst_141 {dimension_numbers = #tpu.dot_dimension_numbers<[1], [0], [0], [1], [0, 0, 1, 1], [], []>} : vector<8x32xf32>, vector<32x32xf32>, vector<8x32xf32> -> vector<8x32xf32>
    %227 = arith.addf %147, %226 : vector<8x32xf32>
    %cst_142 = arith.constant 0.000000e+00 : f32
    %228 = vector.broadcast %cst_142 : f32 to vector<8x32xf32>
    %229 = arith.maximumf %227, %228 : vector<8x32xf32>
    %cst_143 = arith.constant dense<0.000000e+00> : vector<8x32xf32>
    %230 = tpu.matmul %229, %200, %cst_143 {dimension_numbers = #tpu.dot_dimension_numbers<[1], [0], [0], [1], [0, 0, 1, 1], [], []>} : vector<8x32xf32>, vector<32x32xf32>, vector<8x32xf32> -> vector<8x32xf32>
    %231 = arith.addf %144, %230 : vector<8x32xf32>
    %cst_144 = arith.constant 0.000000e+00 : f32
    %232 = vector.broadcast %cst_144 : f32 to vector<8x32xf32>
    %233 = arith.maximumf %231, %232 : vector<8x32xf32>
    %c2_145 = arith.constant 2 : index
    %c0_146 = arith.constant 0 : index
    %c0_147 = arith.constant 0 : index
    %234 = vector.load %arg13[%c2_145, %c0_146, %c0_147] : memref<4x8x32xf32, #tpu.memory_space<vmem>>, vector<1x8x32xf32>
    %235 = vector.shape_cast %234 : vector<1x8x32xf32> to vector<8x32xf32>
    %236 = vector.shape_cast %199 : vector<8x32xf32> to vector<1x8x32xf32>
    tpu.vector_store %arg13[%c2_145, %c0_146, %c0_147], %236 {strides = array<i32>} : memref<4x8x32xf32, #tpu.memory_space<vmem>>, vector<1x8x32xf32>,
    %c3_148 = arith.constant 3 : index
    %c0_149 = arith.constant 0 : index
    %c0_150 = arith.constant 0 : index
    %237 = vector.load %arg13[%c3_148, %c0_149, %c0_150] : memref<4x8x32xf32, #tpu.memory_space<vmem>>, vector<1x8x32xf32>
    %238 = vector.shape_cast %237 : vector<1x8x32xf32> to vector<8x32xf32>
    %239 = vector.shape_cast %233 : vector<8x32xf32> to vector<1x8x32xf32>
    tpu.vector_store %arg13[%c3_148, %c0_149, %c0_150], %239 {strides = array<i32>} : memref<4x8x32xf32, #tpu.memory_space<vmem>>, vector<1x8x32xf32>,
    %c0_151 = arith.constant 0 : index
    %c0_152 = arith.constant 0 : index
    %240 = vector.load %arg10[%c0_151, %c0_152] : memref<32x16xf32, #tpu.memory_space<vmem>>, vector<32x16xf32>
    %cst_153 = arith.constant dense<0.000000e+00> : vector<8x16xf32>
    %241 = tpu.matmul %233, %240, %cst_153 {dimension_numbers = #tpu.dot_dimension_numbers<[1], [0], [0], [1], [0, 0, 1, 1], [], []>} : vector<8x32xf32>, vector<32x16xf32>, vector<8x16xf32> -> vector<8x16xf32>
    %c0_154 = arith.constant 0 : index
    %c0_155 = arith.constant 0 : index
    %242 = vector.load %arg11[%c0_154, %c0_155] : memref<1x16xf32, #tpu.memory_space<vmem>>, vector<1x16xf32>
    %243 = vector.broadcast %242 : vector<1x16xf32> to vector<8x16xf32>
    %244 = arith.addf %241, %243 : vector<8x16xf32>
    %c0_156 = arith.constant 0 : index
    %c0_157 = arith.constant 0 : index
    %245 = vector.load %arg12[%c0_156, %c0_157] : memref<8x16xf32, #tpu.memory_space<vmem>>, vector<8x16xf32>
    tpu.vector_store %arg12[%c0_156, %c0_157], %244 {strides = array<i32>} : memref<8x16xf32, #tpu.memory_space<vmem>>, vector<8x16xf32>,
    return
  }
}

</mosaic_0001>

<bundles_post_ra>
// kernel: cuisine_rnn_forward.1
= control target key start
LH: loop header
LB: loop body
LE: loop exit
PB: predicated region body
PF: predicated region fallthrough
CT: control target
= control target key end

     0   :  { %19 = vsyncpa [#allocation3], 0  ;;  %v4903_v1 = vmov 0.0   ;;  %vm4904_vm0 = vmmov 0   ;;  %s6055_s0 = inlined_call_operand.vmem [shape: f32[8,8,32], index: 0, kind: input, shape index: {}]   ;;  %s6056_s1 = inlined_call_operand.vmem [shape: f32[8,8,32], index: 1, kind: input, shape index: {}]   ;;  %s6057_s2 = inlined_call_operand.vmem [shape: f32[32,32], index: 2, kind: input, shape index: {}]   ;;  %s6058_s3 = inlined_call_operand.vmem [shape: f32[32,32], index: 3, kind: input, shape index: {}]   ;;  %s6059_s4 = inlined_call_operand.vmem [shape: f32[64,32], index: 4, kind: input, shape index: {}]   ;;  %s6060_s5 = inlined_call_operand.vmem [shape: f32[32,32], index: 5, kind: input, shape index: {}]   ;;  %s6061_s6 = inlined_call_operand.vmem [shape: f32[1,32], index: 6, kind: input, shape index: {}]   ;;  %s6062_s7 = inlined_call_operand.vmem [shape: f32[64,32], index: 7, kind: input, shape index: {}]   ;;  %s6063_s8 = inlined_call_operand.vmem [shape: f32[32,32], index: 8, kind: input, shape index: {}]   ;;  %s6064_s9 = inlined_call_operand.vmem [shape: f32[1,32], index: 9, kind: input, shape index: {}]   ;;  %s6065_s10 = inlined_call_operand.vmem [shape: f32[32,16], index: 10, kind: input, shape index: {}]   ;;  %s6066_s11 = inlined_call_operand.vmem [shape: f32[1,16], index: 11, kind: input, shape index: {}]   ;;  %s6067_s12 = inlined_call_operand.hbm [shape: f32[8,16], index: 12, kind: output, shape index: {0}]   ;;  %s6068_s13 = inlined_call_operand.hbm [shape: f32[4,8,32], index: 13, kind: output, shape index: {1}]  }
   0x1   :  { %v4983_v0 = vld [vmem:[%s6057_s2 + $0x18] sm:$0xff]  ;;  %4185 = vmatprep.subr.mxu0 %v4903_v1  ;;  %v4989_v2 = vld [vmem:[%s6057_s2 + $0x10] sm:$0xff]  ;;  %4193 = vmatprep.mubr.msk.f32.mxu0 %vm4904_vm0, %v4903_v1 }
   0x2   :  { %20 = vsyncpa [#allocation5], 0  ;;  %4186 = vmatpush3.msra.mxu0 %v4983_v0  ;;  %4196 = vmatprep.subr.mxu1 %v4903_v1  ;;  %v4999_v3 = vld [vmem:[%s6057_s2 + $0x8] sm:$0xff]  ;;  %v5008_v4 = vld [vmem:[%s6057_s2] sm:$0xff]  ;;  %vm79_vm1 = vcmask 261120   ;;  %s4905_s27 = smov 32  }
   0x3   :  { %4187 = vmatprep.subr.mxu0 %v4903_v1  ;;  %4197 = vmatpush3.msra.mxu1 %v4983_v0  ;;  %v45_v5 = vld [vmem:[%s6055_s0] sm:$0xff]  ;;  %v3814_v10 = vld [vmem:[%s6055_s0 + $0x8] sm:$0xff]  ;;  %v3815_v15 = vld [vmem:[%s6055_s0 + $0x10] sm:$0xff]  ;;  %vm1341_vm2 = vcmask 523264   ;;  %s4906_s26 = smov [#allocation4]  }
   0x4   :  { %4188 = vmatpush3.msra.mxu0 %v4989_v2  ;;  %4198 = vmatprep.subr.mxu1 %v4903_v1  ;;  %v3816_v20 = vld [vmem:[%s6055_s0 + $0x18] sm:$0xff]  ;;  %v3817_v25 = vld [vmem:[%s6055_s0 + $0x20] sm:$0xff]  ;;  %v3818_v30 = vld [vmem:[%s6055_s0 + $0x28] sm:$0xff]  ;;  %s3799_s28 = sshll.u32 %s4906_s26, 4  ;;  %s3800_s28 = int_to_ptr.vmem [resolvable:$true] %s3799_s28 }
   0x5   :  { %4189 = vmatprep.subr.mxu0 %v4903_v1  ;;  %4199 = vmatpush3.msra.mxu1 %v4989_v2  ;;  %v5137_v35 = vld [vmem:[%s6058_s3 + $0x18] sm:$0xff]  ;;  %v5145_v36 = vld [vmem:[%s6058_s3 + $0x10] sm:$0xff]  ;;  %v5154_v37 = vld [vmem:[%s6058_s3 + $0x8] sm:$0xff]  ;;  %s4859_s29 = scalar_lea.vmem %s3800_s28, 512  ;;  %p4864_p1 = scmp.lt.s32.totalorder %s3800_s28, %s3800_s28 }
   0x6   :  { %4190 = vmatpush3.msra.mxu0 %v4999_v3  ;;  %4200 = vmatprep.subr.mxu1 %v4903_v1  ;;  %v5161_v38 = vld [vmem:[%s6058_s3] sm:$0xff]  ;;  %v3819_v39 = vld [vmem:[%s6055_s0 + $0x30] sm:$0xff]  ;;  %v3827_v44 = vld [vmem:[%s6056_s1 + $0x38] sm:$0xff]  ;;  %p4860_p0 = scmp.ne.s32.totalorder %s3800_s28, %s4859_s29  ;;  %p4865_p2 = scmp.lt.s32.totalorder %s4859_s29, %s4859_s29 }
   0x7   :  { %4191 = vmatprep.subr.mxu0 %v4903_v1  ;;  %4201 = vmatpush3.msra.mxu1 %v4999_v3  ;;  %v3820_v49 = vld [vmem:[%s6055_s0 + $0x38] sm:$0xff]  ;;  %v3826_v54 = vld [vmem:[%s6056_s1 + $0x30] sm:$0xff]  ;;  %v3825_v59 = vld [vmem:[%s6056_s1 + $0x28] sm:$0xff] }
   0x8   :  { %4192 = vmatpush3.msra.mxu0 %v5008_v4  ;;  %4202 = vmatprep.subr.mxu1 %v4903_v1  ;;  %p4866_p3 = por %p4865_p2, %p4864_p1 }
   0x9   :  { %4194 = vmatmul.mubr.f32.vlgmr.msra.gmra.mxu0 %v4903_v1  ;;  %4203 = vmatpush3.msra.mxu1 %v5008_v4 }
   0xa   :  { %4204 = vmatprep.mubr.msk.f32.mxu1 %vm4904_vm0, %v4903_v1  ;;  %4207 = vmatprep.subr.mxu0 %v4903_v1  ;;  %p4867_p4 = pnand %p4866_p3, %p4860_p0 }
   0xb   :  { %4208 = vmatpush3.msra.mxu0 %v4983_v0  ;;  %4215 = vmatprep.mubr.msk.f32.mxu0 %vm4904_vm0, %v4903_v1 }
   0xc   :  { %4209 = vmatprep.subr.mxu0 %v4903_v1  ;;  %4218 = vmatprep.subr.mxu1 %v4903_v1 }
   0xd   :  { %4210 = vmatpush3.msra.mxu0 %v4989_v2 }
   0xe   :  { %4211 = vmatprep.subr.mxu0 %v4903_v1 }
   0xf   :  { %4212 = vmatpush3.msra.mxu0 %v4999_v3 }
  0x10   :  { %4213 = vmatprep.subr.mxu0 %v4903_v1 }
  0x11   :  { %4214 = vmatpush3.msra.mxu0 %v5008_v4 }
  0x12   :  { %4229 = vmatprep.subr.mxu0 %v4903_v1 }
  0xc9   :  { %v149_v6 = vpop.f32.mrf.mxu0 }
  0xca   :  { %v5036_v7 = vadd.f32 %v149_v6, %v45_v5  ;;  %v3823_v6 = vld [vmem:[%s6056_s1 + $0x18] sm:$0xff] }
  0xcb   :  { %v4195_v8 = vpop.f32.mrf.mxu0 }
  0xcc   :  { %v154_v9 = vmax.f32 %v5036_v7, 0.0 }
  0xce   :  { %4205 = vmatmul.mubr.msk.f32.vlgmr.msra.gmra.mxu1 %vm79_vm1, %v154_v9 }
  0xcf   :  { %4219 = vmatpush3.msra.mxu1 %v4983_v0  ;;  %4226 = vmatprep.mubr.msk.f32.mxu1 %vm4904_vm0, %v4903_v1 }
  0xd0   :  { %4220 = vmatprep.subr.mxu1 %v4903_v1 }
  0xd1   :  { %4221 = vmatpush3.msra.mxu1 %v4989_v2 }
  0xd2   :  { %4222 = vmatprep.subr.mxu1 %v4903_v1 }
  0xd3   :  { %4223 = vmatpush3.msra.mxu1 %v4999_v3 }
  0xd4   :  { %4224 = vmatprep.subr.mxu1 %v4903_v1 }
  0xd5   :  { %4225 = vmatpush3.msra.mxu1 %v5008_v4 }
  0xd6   :  { %4240 = vmatprep.subr.mxu1 %v4903_v1 }
 0x18e   :  { %v224_v11 = vpop.f32.mrf.mxu1 }
 0x18f   :  { %v5055_v12 = vadd.f32 %v3814_v10, %v224_v11 }
 0x190   :  { %v4206_v13 = vpop.f32.mrf.mxu1 }
 0x191   :  { %v229_v14 = vmax.f32 %v5055_v12, 0.0 }
 0x193   :  { %4216 = vmatmul.mubr.msk.f32.vlgmr.msra.gmra.mxu0 %vm79_vm1, %v229_v14 }
 0x194   :  { %4230 = vmatpush3.msra.mxu0 %v4983_v0  ;;  %4237 = vmatprep.mubr.msk.f32.mxu0 %vm4904_vm0, %v4903_v1 }
 0x195   :  { %4231 = vmatprep.subr.mxu0 %v4903_v1 }
 0x196   :  { %4232 = vmatpush3.msra.mxu0 %v4989_v2 }
 0x197   :  { %4233 = vmatprep.subr.mxu0 %v4903_v1 }
 0x198   :  { %4234 = vmatpush3.msra.mxu0 %v4999_v3 }
 0x199   :  { %4235 = vmatprep.subr.mxu0 %v4903_v1 }
 0x19a   :  { %4236 = vmatpush3.msra.mxu0 %v5008_v4 }
 0x19b   :  { %4251 = vmatprep.subr.mxu0 %v4903_v1 }
 0x253   :  { %v299_v16 = vpop.f32.mrf.mxu0 }
 0x254   :  { %v5074_v17 = vadd.f32 %v3815_v15, %v299_v16  ;;  %v3822_v15 = vld [vmem:[%s6056_s1 + $0x10] sm:$0xff] }
 0x255   :  { %v4217_v18 = vpop.f32.mrf.mxu0 }
 0x256   :  { %v304_v19 = vmax.f32 %v5074_v17, 0.0 }
 0x258   :  { %4227 = vmatmul.mubr.msk.f32.vlgmr.msra.gmra.mxu1 %vm79_vm1, %v304_v19 }
 0x259   :  { %4241 = vmatpush3.msra.mxu1 %v4983_v0  ;;  %4248 = vmatprep.mubr.msk.f32.mxu1 %vm4904_vm0, %v4903_v1 }
 0x25a   :  { %4242 = vmatprep.subr.mxu1 %v4903_v1 }
 0x25b   :  { %4243 = vmatpush3.msra.mxu1 %v4989_v2 }
 0x25c   :  { %4244 = vmatprep.subr.mxu1 %v4903_v1 }
 0x25d   :  { %4245 = vmatpush3.msra.mxu1 %v4999_v3 }
 0x25e   :  { %4246 = vmatprep.subr.mxu1 %v4903_v1 }
 0x25f   :  { %4247 = vmatpush3.msra.mxu1 %v5008_v4 }
 0x260   :  { %4262 = vmatprep.subr.mxu1 %v4903_v1 }
 0x318   :  { %v374_v21 = vpop.f32.mrf.mxu1 }
 0x319   :  { %v5093_v22 = vadd.f32 %v3816_v20, %v374_v21 }
 0x31a   :  { %v4228_v23 = vpop.f32.mrf.mxu1 }
 0x31b   :  { %v379_v24 = vmax.f32 %v5093_v22, 0.0  ;;  %v3821_v23 = vld [vmem:[%s6056_s1 + $0x8] sm:$0xff] }
 0x31d   :  { %4238 = vmatmul.mubr.msk.f32.vlgmr.msra.gmra.mxu0 %vm79_vm1, %v379_v24 }
 0x31e   :  { %4252 = vmatpush3.msra.mxu0 %v4983_v0  ;;  %4259 = vmatprep.mubr.msk.f32.mxu0 %vm4904_vm0, %v4903_v1 }
 0x31f   :  { %4253 = vmatprep.subr.mxu0 %v4903_v1 }
 0x320   :  { %4254 = vmatpush3.msra.mxu0 %v4989_v2 }
 0x321   :  { %4255 = vmatprep.subr.mxu0 %v4903_v1 }
 0x322   :  { %4256 = vmatpush3.msra.mxu0 %v4999_v3 }
 0x323   :  { %4257 = vmatprep.subr.mxu0 %v4903_v1 }
 0x324   :  { %4258 = vmatpush3.msra.mxu0 %v5008_v4 }
 0x325   :  { %4273 = vmatprep.subr.mxu0 %v4903_v1 }
 0x3dd   :  { %v449_v26 = vpop.f32.mrf.mxu0 }
 0x3de   :  { %v5112_v27 = vadd.f32 %v3817_v25, %v449_v26 }
 0x3df   :  { %v4239_v28 = vpop.f32.mrf.mxu0 }
 0x3e0   :  { %v454_v29 = vmax.f32 %v5112_v27, 0.0 }
 0x3e2   :  { %4249 = vmatmul.mubr.msk.f32.vlgmr.msra.gmra.mxu1 %vm79_vm1, %v454_v29 }
 0x3e3   :  { %4263 = vmatpush3.msra.mxu1 %v4983_v0  ;;  %4270 = vmatprep.mubr.msk.f32.mxu1 %vm4904_vm0, %v4903_v1  ;;  %v3824_v0 = vld [vmem:[%s6056_s1 + $0x20] sm:$0xff] }
 0x3e4   :  { %4264 = vmatprep.subr.mxu1 %v4903_v1 }
 0x3e5   :  { %4265 = vmatpush3.msra.mxu1 %v4989_v2 }
 0x3e6   :  { %4266 = vmatprep.subr.mxu1 %v4903_v1 }
 0x3e7   :  { %4267 = vmatpush3.msra.mxu1 %v4999_v3 }
 0x3e8   :  { %4268 = vmatprep.subr.mxu1 %v4903_v1 }
 0x3e9   :  { %4269 = vmatpush3.msra.mxu1 %v5008_v4 }
 0x3ea   :  { %4284 = vmatprep.subr.mxu1 %v4903_v1 }
 0x4a2   :  { %v524_v31 = vpop.f32.mrf.mxu1 }
 0x4a3   :  { %v5131_v32 = vadd.f32 %v3818_v30, %v524_v31  ;;  %v5307_v31 = vld [vmem:[%s6059_s4 + $0x38] sm:$0xff] }
 0x4a4   :  { %v4250_v33 = vpop.f32.mrf.mxu1 }
 0x4a5   :  { %v529_v34 = vmax.f32 %v5131_v32, 0.0  ;;  %v5312_v33 = vld [vmem:[%s6059_s4 + $0x30] sm:$0xff]  ;;  %v5535_v32 = vld [vmem:[%s6062_s7 + $0x38] sm:$0xff] }
 0x4a7   :  { %4260 = vmatmul.mubr.msk.f32.vlgmr.msra.gmra.mxu0 %vm79_vm1, %v529_v34 }
 0x4a8   :  { %4274 = vmatpush3.msra.mxu0 %v5137_v35  ;;  %4281 = vmatprep.mubr.msk.f32.mxu0 %vm4904_vm0, %v4903_v1 }
 0x4a9   :  { %4275 = vmatprep.subr.mxu0 %v4903_v1 }
 0x4aa   :  { %4276 = vmatpush3.msra.mxu0 %v5145_v36 }
 0x4ab   :  { %4277 = vmatprep.subr.mxu0 %v4903_v1 }
 0x4ac   :  { %4278 = vmatpush3.msra.mxu0 %v5154_v37 }
 0x4ad   :  { %4279 = vmatprep.subr.mxu0 %v4903_v1 }
 0x4ae   :  { %4280 = vmatpush3.msra.mxu0 %v5161_v38 }
 0x4af   :  { %4282 = vmatmul.mubr.f32.vlgmr.msra.gmra.mxu0 %v4903_v1  ;;  %4295 = vmatprep.subr.mxu0 %v4903_v1 }
 0x4b0   :  { %4296 = vmatpush3.msra.mxu0 %v5137_v35  ;;  %4303 = vmatprep.mubr.msk.f32.mxu0 %vm4904_vm0, %v4903_v1 }
 0x4b1   :  { %4297 = vmatprep.subr.mxu0 %v4903_v1 }
 0x4b2   :  { %4298 = vmatpush3.msra.mxu0 %v5145_v36 }
 0x4b3   :  { %4299 = vmatprep.subr.mxu0 %v4903_v1 }
 0x4b4   :  { %4300 = vmatpush3.msra.mxu0 %v5154_v37 }
 0x4b5   :  { %4301 = vmatprep.subr.mxu0 %v4903_v1 }
 0x4b6   :  { %4302 = vmatpush3.msra.mxu0 %v5161_v38 }
 0x4b7   :  { %4317 = vmatprep.subr.mxu0 %v4903_v1 }
 0x567   :  { %v599_v40 = vpop.f32.mrf.mxu0 }
 0x568   :  { %v5181_v41 = vadd.f32 %v3819_v39, %v599_v40  ;;  %v5356_v39 = vld [vmem:[%s6059_s4 + $0x8] sm:$0xff]  ;;  %v5365_v40 = vld [vmem:[%s6059_s4] sm:$0xff] }
 0x569   :  { %v4261_v42 = vpop.f32.mrf.mxu0 }
 0x56a   :  { %v604_v43 = vmax.f32 %v5181_v41, 0.0  ;;  %v60_v42 = vld [vmem:[%s6056_s1] sm:$0xff]  ;;  %v5554_v41 = vld [vmem:[%s6062_s7 + $0x28] sm:$0xff] }
 0x56c   :  { %4271 = vmatmul.mubr.msk.f32.vlgmr.msra.gmra.mxu1 %vm79_vm1, %v604_v43 }
 0x56d   :  { %4285 = vmatpush3.msra.mxu1 %v5137_v35  ;;  %4292 = vmatprep.mubr.msk.f32.mxu1 %vm4904_vm0, %v4903_v1 }
 0x56e   :  { %4286 = vmatprep.subr.mxu1 %v4903_v1 }
 0x56f   :  { %v750_v45 = vpop.f32.mrf.mxu0  ;;  %4287 = vmatpush3.msra.mxu1 %v5145_v36 }
 0x570   :  { %v5195_v46 = vadd.f32 %v3827_v44, %v750_v45  ;;  %4288 = vmatprep.subr.mxu1 %v4903_v1 }
 0x571   :  { %v4283_v47 = vpop.f32.mrf.mxu0  ;;  %4289 = vmatpush3.msra.mxu1 %v5154_v37 }
 0x572   :  { %v755_v48 = vmax.f32 %v5195_v46, 0.0  ;;  %4290 = vmatprep.subr.mxu1 %v4903_v1 }
 0x573   :  { %4291 = vmatpush3.msra.mxu1 %v5161_v38 }
 0x574   :  { %4293 = vmatmul.mubr.msk.f32.vlgmr.msra.gmra.mxu1 %vm79_vm1, %v755_v48  ;;  %4306 = vmatprep.subr.mxu1 %v4903_v1 }
 0x575   :  { %4307 = vmatpush3.msra.mxu1 %v5137_v35  ;;  %4314 = vmatprep.mubr.msk.f32.mxu1 %vm4904_vm0, %v4903_v1 }
 0x576   :  { %4308 = vmatprep.subr.mxu1 %v4903_v1 }
 0x577   :  { %4309 = vmatpush3.msra.mxu1 %v5145_v36 }
 0x578   :  { %4310 = vmatprep.subr.mxu1 %v4903_v1 }
 0x579   :  { %4311 = vmatpush3.msra.mxu1 %v5154_v37 }
 0x57a   :  { %4312 = vmatprep.subr.mxu1 %v4903_v1 }
 0x57b   :  { %4313 = vmatpush3.msra.mxu1 %v5161_v38 }
 0x57c   :  { %4328 = vmatprep.subr.mxu1 %v4903_v1 }
 0x62c   :  { %v674_v50 = vpop.f32.mrf.mxu1 }
 0x62d   :  { %v5219_v51 = vadd.f32 %v3820_v49, %v674_v50 }
 0x62e   :  { %v4272_v52 = vpop.f32.mrf.mxu1 }
 0x62f   :  { %v679_v53 = vmax.f32 %v5219_v51, 0.0  ;;  %v5597_v51 = vld [vmem:[%s6062_s7 + $0x8] sm:$0xff] }
 0x631   :  { %1281 = vst.msk [vmem:[#allocation4] sm:$0xff] %vm79_vm1, %v679_v53 }
 0x634   :  { %v825_v55 = vpop.f32.mrf.mxu1 }
 0x635   :  { %v829_v56 = vadd.f32 %v3826_v54, %v825_v55  ;;  %v5563_v54 = vld [vmem:[%s6062_s7 + $0x20] sm:$0xff]  ;;  %v5572_v55 = vld [vmem:[%s6062_s7 + $0x18] sm:$0xff] }
 0x636   :  { %v4294_v57 = vpop.f32.mrf.mxu1 }
 0x637   :  { %v830_v58 = vmax.f32 %v829_v56, 0.0  ;;  %v5588_v57 = vld [vmem:[%s6062_s7 + $0x10] sm:$0xff] }
 0x639   :  { %4304 = vmatmul.mubr.msk.f32.vlgmr.msra.gmra.mxu0 %vm79_vm1, %v830_v58 }
 0x63a   :  { %4318 = vmatpush3.msra.mxu0 %v5137_v35  ;;  %4325 = vmatprep.mubr.msk.f32.mxu0 %vm4904_vm0, %v4903_v1 }
 0x63b   :  { %4319 = vmatprep.subr.mxu0 %v4903_v1 }
 0x63c   :  { %4320 = vmatpush3.msra.mxu0 %v5145_v36 }
 0x63d   :  { %4321 = vmatprep.subr.mxu0 %v4903_v1 }
 0x63e   :  { %4322 = vmatpush3.msra.mxu0 %v5154_v37 }
 0x63f   :  { %4323 = vmatprep.subr.mxu0 %v4903_v1 }
 0x640   :  { %4324 = vmatpush3.msra.mxu0 %v5161_v38 }
 0x641   :  { %4339 = vmatprep.subr.mxu0 %v4903_v1 }
 0x6f9   :  { %v900_v60 = vpop.f32.mrf.mxu0 }
 0x6fa   :  { %v5242_v61 = vadd.f32 %v3825_v59, %v900_v60  ;;  %v5750_v59 = vld [vmem:[%s6060_s5 + $0x10] sm:$0xff]  ;;  %v5759_v60 = vld [vmem:[%s6060_s5 + $0x8] sm:$0xff] }
 0x6fb   :  { %v4305_v62 = vpop.f32.mrf.mxu0 }
 0x6fc   :  { %v905_v63 = vmax.f32 %v5242_v61, 0.0  ;;  %v5768_v61 = vld [vmem:[%s6060_s5] sm:$0xff] }
 0x6fe   :  { %4315 = vmatmul.mubr.msk.f32.vlgmr.msra.gmra.mxu1 %vm79_vm1, %v905_v63 }
 0x6ff   :  { %4329 = vmatpush3.msra.mxu1 %v5137_v35  ;;  %4336 = vmatprep.mubr.msk.f32.mxu1 %vm4904_vm0, %v4903_v1 }
 0x700   :  { %4330 = vmatprep.subr.mxu1 %v4903_v1 }
 0x701   :  { %4331 = vmatpush3.msra.mxu1 %v5145_v36 }
 0x702   :  { %4332 = vmatprep.subr.mxu1 %v4903_v1 }
 0x703   :  { %4333 = vmatpush3.msra.mxu1 %v5154_v37 }
 0x704   :  { %4334 = vmatprep.subr.mxu1 %v4903_v1 }
 0x705   :  { %4335 = vmatpush3.msra.mxu1 %v5161_v38 }
 0x706   :  { %4350 = vmatprep.subr.mxu1 %v4903_v1 }
 0x7be   :  { %v975_v2 = vpop.f32.mrf.mxu1 }
 0x7bf   :  { %v979_v3 = vadd.f32 %v3824_v0, %v975_v2  ;;  %v3842_v0 = vld [vmem:[%s6061_s6] ss:$0 sm:$0xff] }
 0x7c0   :  { %v4316_v4 = vpop.f32.mrf.mxu1 }
 0x7c1   :  { %v980_v5 = vmax.f32 %v979_v3, 0.0 }
 0x7c3   :  { %1301 = vrot.lane.b32.xlu1 %v980_v5, %s4905_s27  ;;  %4326 = vmatmul.mubr.msk.f32.vlgmr.msra.gmra.mxu0 %vm79_vm1, %v980_v5 }
 0x7c4   :  { %4340 = vmatpush3.msra.mxu0 %v5137_v35  ;;  %4347 = vmatprep.mubr.msk.f32.mxu0 %vm4904_vm0, %v4903_v1 }
 0x7c5   :  { %4341 = vmatprep.subr.mxu0 %v4903_v1 }
 0x7c6   :  { %4342 = vmatpush3.msra.mxu0 %v5145_v36 }
 0x7c7   :  { %1309 = vrot.lane.b32.xlu1 %v830_v58, %s4905_s27  ;;  %4343 = vmatprep.subr.mxu0 %v4903_v1  ;;  %v5740_v58 = vld [vmem:[%s6060_s5 + $0x18] sm:$0xff] }
 0x7c8   :  { %4344 = vmatpush3.msra.mxu0 %v5154_v37 }
 0x7c9   :  { %4345 = vmatprep.subr.mxu0 %v4903_v1 }
 0x7ca   :  { %4346 = vmatpush3.msra.mxu0 %v5161_v38 }
 0x7cb   :  { %4361 = vmatprep.subr.mxu0 %v4903_v1 }
 0x835   :  { %v1302_v52 = vpop.permute.xlu1 %1301 }
 0x836   :  { %v5476_v22 = vsel %vm79_vm1, %v454_v29, %v1302_v52 }
 0x883   :  { %v1050_v8 = vpop.f32.mrf.mxu0 }
 0x884   :  { %v1054_v10 = vadd.f32 %v3823_v6, %v1050_v8 }
 0x885   :  { %v4327_v11 = vpop.f32.mrf.mxu0 }
 0x886   :  { %v1055_v13 = vmax.f32 %v1054_v10, 0.0 }
 0x888   :  { %1297 = vrot.lane.b32.xlu1 %v1055_v13, %s4905_s27  ;;  %4337 = vmatmul.mubr.msk.f32.vlgmr.msra.gmra.mxu1 %vm79_vm1, %v1055_v13 }
 0x889   :  { %4351 = vmatpush3.msra.mxu1 %v5137_v35  ;;  %4358 = vmatprep.mubr.msk.f32.mxu1 %vm4904_vm0, %v4903_v1  ;;  %v5320_v35 = vld [vmem:[%s6059_s4 + $0x28] sm:$0xff] }
 0x88a   :  { %4352 = vmatprep.subr.mxu1 %v4903_v1 }
 0x88b   :  { %4353 = vmatpush3.msra.mxu1 %v5145_v36  ;;  %v5329_v36 = vld [vmem:[%s6059_s4 + $0x20] sm:$0xff] }
 0x88c   :  { %1313 = vrot.lane.b32.xlu1 %v755_v48, %s4905_s27  ;;  %4354 = vmatprep.subr.mxu1 %v4903_v1 }
 0x88d   :  { %4355 = vmatpush3.msra.mxu1 %v5154_v37  ;;  %v5338_v37 = vld [vmem:[%s6059_s4 + $0x18] sm:$0xff] }
 0x88e   :  { %4356 = vmatprep.subr.mxu1 %v4903_v1 }
 0x88f   :  { %4357 = vmatpush3.msra.mxu1 %v5161_v38  ;;  %v5347_v38 = vld [vmem:[%s6059_s4 + $0x10] sm:$0xff] }
 0x890   :  { %4380 = vmatprep.subr.mxu1 %v4903_v1 }
 0x948   :  { %v1125_v16 = vpop.f32.mrf.mxu1 }
 0x949   :  { %v1129_v18 = vadd.f32 %v3822_v15, %v1125_v16 }
 0x94a   :  { %v4338_v20 = vpop.f32.mrf.mxu1 }
 0x94b   :  { %v1130_v21 = vmax.f32 %v1129_v18, 0.0 }
 0x94d   :  { %4348 = vmatmul.mubr.msk.f32.vlgmr.msra.gmra.mxu0 %vm79_vm1, %v1130_v21 }
 0x94e   :  { %4377 = vmatprep.mubr.msk.f32.mxu0 %vm4904_vm0, %v4903_v1  ;;  %4362 = vmatpush3.msra.mxu0 %v5307_v31 }
 0x94f   :  { %4363 = vmatprep.subr.mxu0 %v4903_v1 }
 0x950   :  { %4364 = vmatpush3.msra.mxu0 %v5312_v33 }
 0x951   :  { %4365 = vmatprep.subr.mxu0 %v4903_v1 }
 0x952   :  { %4366 = vmatpush3.msra.mxu0 %v5320_v35 }
 0x953   :  { %4367 = vmatprep.subr.mxu0 %v4903_v1 }
 0x954   :  { %4368 = vmatpush3.msra.mxu0 %v5329_v36 }
 0x955   :  { %4369 = vmatprep.subr.mxu0 %v4903_v1 }
 0x956   :  { %4370 = vmatpush3.msra.mxu0 %v5338_v37 }
 0x957   :  { %4371 = vmatprep.subr.mxu0 %v4903_v1 }
 0x958   :  { %4372 = vmatpush3.msra.mxu0 %v5347_v38 }
 0x959   :  { %4373 = vmatprep.subr.mxu0 %v4903_v1 }
 0x95a   :  { %4374 = vmatpush3.msra.mxu0 %v5356_v39 }
 0x95b   :  { %4375 = vmatprep.subr.mxu0 %v4903_v1 }
 0x95c   :  { %4376 = vmatpush3.msra.mxu0 %v5365_v40 }
 0x95d   :  { %4399 = vmatprep.subr.mxu0 %v4903_v1 }
 0xa0d   :  { %v1200_v25 = vpop.f32.mrf.mxu0 }
 0xa0e   :  { %v1204_v26 = vadd.f32 %v3821_v23, %v1200_v25 }
 0xa0f   :  { %v4349_v28 = vpop.f32.mrf.mxu0 }
 0xa10   :  { %v1205_v30 = vmax.f32 %v1204_v26, 0.0 }
 0xa12   :  { %4359 = vmatmul.mubr.msk.f32.vlgmr.msra.gmra.mxu1 %vm79_vm1, %v1205_v30 }
 0xa13   :  { %4396 = vmatprep.mubr.msk.f32.mxu1 %vm4904_vm0, %v4903_v1  ;;  %4381 = vmatpush3.msra.mxu1 %v5307_v31 }
 0xa14   :  { %4382 = vmatprep.subr.mxu1 %v4903_v1 }
 0xa15   :  { %4383 = vmatpush3.msra.mxu1 %v5312_v33 }
 0xa16   :  { %4384 = vmatprep.subr.mxu1 %v4903_v1 }
 0xa17   :  { %4385 = vmatpush3.msra.mxu1 %v5320_v35 }
 0xa18   :  { %4386 = vmatprep.subr.mxu1 %v4903_v1 }
 0xa19   :  { %4387 = vmatpush3.msra.mxu1 %v5329_v36 }
 0xa1a   :  { %4388 = vmatprep.subr.mxu1 %v4903_v1 }
 0xa1b   :  { %4389 = vmatpush3.msra.mxu1 %v5338_v37 }
 0xa1c   :  { %4390 = vmatprep.subr.mxu1 %v4903_v1 }
 0xa1d   :  { %4391 = vmatpush3.msra.mxu1 %v5347_v38 }
 0xa1e   :  { %4392 = vmatprep.subr.mxu1 %v4903_v1 }
 0xa1f   :  { %4393 = vmatpush3.msra.mxu1 %v5356_v39 }
 0xa20   :  { %4394 = vmatprep.subr.mxu1 %v4903_v1 }
 0xa21   :  { %4395 = vmatpush3.msra.mxu1 %v5365_v40 }
 0xa22   :  { %4418 = vmatprep.subr.mxu1 %v4903_v1 }
 0xad2   :  { %v1275_v44 = vpop.f32.mrf.mxu1 }
 0xad3   :  { %v1279_v45 = vadd.f32 %v1275_v44, %v60_v42 }
 0xad4   :  { %v4360_v46 = vpop.f32.mrf.mxu1 }
 0xad5   :  { %v1280_v47 = vmax.f32 %v1279_v45, 0.0 }
 0xad7   :  { %1283 = vst.msk [vmem:[#allocation4 + $0x8] sm:$0xff] %vm79_vm1, %v1280_v47  ;;  %1285 = vrot.lane.b32.xlu0 %v1280_v47, %s4905_s27 }
 0xadb   :  { %1293 = vrot.lane.b32.xlu0 %v1130_v21, %s4905_s27 }
 0xadf   :  { %1289 = vrot.lane.b32.xlu0 %v1205_v30, %s4905_s27 }
 0xae3   :  { %1305 = vrot.lane.b32.xlu0 %v905_v63, %s4905_s27 }
 0xb49   :  { %v1286_v48 = vpop.permute.xlu0 %1285 }
 0xb4a   :  { %v5389_v49 = vsel %vm79_vm1, %v154_v9, %v1286_v48 }
 0xb4b   :  { %4378 = vmatmul.mubr.msk.f32.vlgmr.msra.gmra.mxu0 %vm1341_vm2, %v5389_v49 }
 0xb4c   :  { %4400 = vmatpush3.msra.mxu0 %v5307_v31  ;;  %4415 = vmatprep.mubr.msk.f32.mxu0 %vm4904_vm0, %v4903_v1 }
 0xb4d   :  { %4401 = vmatprep.subr.mxu0 %v4903_v1  ;;  %v1294_v50 = vpop.permute.xlu0 %1293 }
 0xb4e   :  { %4402 = vmatpush3.msra.mxu0 %v5312_v33  ;;  %v5425_v12 = vsel %vm79_vm1, %v304_v19, %v1294_v50 }
 0xb4f   :  { %4403 = vmatprep.subr.mxu0 %v4903_v1 }
 0xb50   :  { %4404 = vmatpush3.msra.mxu0 %v5320_v35 }
 0xb51   :  { %4405 = vmatprep.subr.mxu0 %v4903_v1  ;;  %v1290_v7 = vpop.permute.xlu0 %1289 }
 0xb52   :  { %4406 = vmatpush3.msra.mxu0 %v5329_v36  ;;  %v5405_v9 = vsel %vm79_vm1, %v229_v14, %v1290_v7  ;;  %v5432_v14 = vpop.permute.xlu1 %1309 }
 0xb53   :  { %4407 = vmatprep.subr.mxu0 %v4903_v1  ;;  %4397 = vmatmul.mubr.msk.f32.vlgmr.msra.gmra.mxu1 %vm1341_vm2, %v5405_v9  ;;  %v5527_v29 = vsel %vm79_vm1, %v604_v43, %v5432_v14 }
 0xb54   :  { %4408 = vmatpush3.msra.mxu0 %v5338_v37  ;;  %4419 = vmatpush3.msra.mxu1 %v5307_v31 }
 0xb55   :  { %4409 = vmatprep.subr.mxu0 %v4903_v1  ;;  %4420 = vmatprep.subr.mxu1 %v4903_v1 }
 0xb56   :  { %4410 = vmatpush3.msra.mxu0 %v5347_v38  ;;  %4421 = vmatpush3.msra.mxu1 %v5312_v33  ;;  %v1298_v17 = vpop.permute.xlu1 %1297 }
 0xb57   :  { %4411 = vmatprep.subr.mxu0 %v4903_v1  ;;  %4422 = vmatprep.subr.mxu1 %v4903_v1  ;;  %v5451_v19 = vsel %vm79_vm1, %v379_v24, %v1298_v17  ;;  %v1306_v24 = vpop.permute.xlu0 %1305 }
 0xb58   :  { %4412 = vmatpush3.msra.mxu0 %v5356_v39  ;;  %4423 = vmatpush3.msra.mxu1 %v5320_v35  ;;  %v5501_v27 = vsel %vm79_vm1, %v529_v34, %v1306_v24  ;;  %v5545_v34 = vld [vmem:[%s6062_s7 + $0x30] sm:$0xff] }
 0xb59   :  { %4413 = vmatprep.subr.mxu0 %v4903_v1  ;;  %4424 = vmatprep.subr.mxu1 %v4903_v1 }
 0xb5a   :  { %4414 = vmatpush3.msra.mxu0 %v5365_v40  ;;  %4425 = vmatpush3.msra.mxu1 %v5329_v36  ;;  %v1314_v43 = vpop.permute.xlu1 %1313 }
 0xb5b   :  { %4416 = vmatmul.mubr.msk.f32.vlgmr.msra.gmra.mxu0 %vm1341_vm2, %v5425_v12  ;;  %4426 = vmatprep.subr.mxu1 %v4903_v1  ;;  %v5577_v56 = vsel %vm79_vm1, %v679_v53, %v1314_v43  ;;  %v5606_v53 = vld [vmem:[%s6062_s7] sm:$0xff] }
 0xb5c   :  { %4437 = vmatprep.subr.mxu0 %v4903_v1  ;;  %4427 = vmatpush3.msra.mxu1 %v5338_v37 }
 0xb5d   :  { %4438 = vmatpush3.msra.mxu0 %v5307_v31  ;;  %4428 = vmatprep.subr.mxu1 %v4903_v1 }
 0xb5e   :  { %4439 = vmatprep.subr.mxu0 %v4903_v1  ;;  %4429 = vmatpush3.msra.mxu1 %v5347_v38 }
 0xb5f   :  { %4440 = vmatpush3.msra.mxu0 %v5312_v33  ;;  %4430 = vmatprep.subr.mxu1 %v4903_v1 }
 0xb60   :  { %4441 = vmatprep.subr.mxu0 %v4903_v1  ;;  %4431 = vmatpush3.msra.mxu1 %v5356_v39 }
 0xb61   :  { %4442 = vmatpush3.msra.mxu0 %v5320_v35  ;;  %4432 = vmatprep.subr.mxu1 %v4903_v1 }
 0xb62   :  { %4443 = vmatprep.subr.mxu0 %v4903_v1  ;;  %4433 = vmatpush3.msra.mxu1 %v5365_v40 }
 0xb63   :  { %4434 = vmatprep.mubr.msk.f32.mxu1 %vm4904_vm0, %v4903_v1  ;;  %4444 = vmatpush3.msra.mxu0 %v5329_v36 }
 0xb64   :  { %4435 = vmatmul.mubr.msk.f32.vlgmr.msra.gmra.mxu1 %vm1341_vm2, %v5451_v19  ;;  %4445 = vmatprep.subr.mxu0 %v4903_v1 }
 0xb65   :  { %4456 = vmatprep.subr.mxu1 %v4903_v1  ;;  %4446 = vmatpush3.msra.mxu0 %v5338_v37 }
 0xb66   :  { %4457 = vmatpush3.msra.mxu1 %v5307_v31  ;;  %4447 = vmatprep.subr.mxu0 %v4903_v1 }
 0xb67   :  { %4458 = vmatprep.subr.mxu1 %v4903_v1  ;;  %4448 = vmatpush3.msra.mxu0 %v5347_v38 }
 0xb68   :  { %4459 = vmatpush3.msra.mxu1 %v5312_v33  ;;  %4449 = vmatprep.subr.mxu0 %v4903_v1 }
 0xb69   :  { %4460 = vmatprep.subr.mxu1 %v4903_v1  ;;  %4450 = vmatpush3.msra.mxu0 %v5356_v39 }
 0xb6a   :  { %4461 = vmatpush3.msra.mxu1 %v5320_v35  ;;  %4451 = vmatprep.subr.mxu0 %v4903_v1 }
 0xb6b   :  { %4462 = vmatprep.subr.mxu1 %v4903_v1  ;;  %4452 = vmatpush3.msra.mxu0 %v5365_v40 }
 0xb6c   :  { %4453 = vmatprep.mubr.msk.f32.mxu0 %vm4904_vm0, %v4903_v1  ;;  %4463 = vmatpush3.msra.mxu1 %v5329_v36 }
 0xb6d   :  { %4454 = vmatmul.mubr.msk.f32.vlgmr.msra.gmra.mxu0 %vm1341_vm2, %v5476_v22  ;;  %4464 = vmatprep.subr.mxu1 %v4903_v1 }
 0xb6e   :  { %4475 = vmatprep.subr.mxu0 %v4903_v1  ;;  %4465 = vmatpush3.msra.mxu1 %v5338_v37 }
 0xb6f   :  { %4476 = vmatpush3.msra.mxu0 %v5307_v31  ;;  %4466 = vmatprep.subr.mxu1 %v4903_v1 }
 0xb70   :  { %4477 = vmatprep.subr.mxu0 %v4903_v1  ;;  %4467 = vmatpush3.msra.mxu1 %v5347_v38 }
 0xb71   :  { %4478 = vmatpush3.msra.mxu0 %v5312_v33  ;;  %4468 = vmatprep.subr.mxu1 %v4903_v1 }
 0xb72   :  { %4479 = vmatprep.subr.mxu0 %v4903_v1  ;;  %4469 = vmatpush3.msra.mxu1 %v5356_v39 }
 0xb73   :  { %4480 = vmatpush3.msra.mxu0 %v5320_v35  ;;  %4470 = vmatprep.subr.mxu1 %v4903_v1 }
 0xb74   :  { %4481 = vmatprep.subr.mxu0 %v4903_v1  ;;  %4471 = vmatpush3.msra.mxu1 %v5365_v40 }
 0xb75   :  { %4472 = vmatprep.mubr.msk.f32.mxu1 %vm4904_vm0, %v4903_v1  ;;  %4482 = vmatpush3.msra.mxu0 %v5329_v36 }
 0xb76   :  { %4473 = vmatmul.mubr.msk.f32.vlgmr.msra.gmra.mxu1 %vm1341_vm2, %v5501_v27  ;;  %4483 = vmatprep.subr.mxu0 %v4903_v1 }
 0xb77   :  { %4494 = vmatprep.subr.mxu1 %v4903_v1  ;;  %4484 = vmatpush3.msra.mxu0 %v5338_v37 }
 0xb78   :  { %4495 = vmatpush3.msra.mxu1 %v5307_v31  ;;  %4485 = vmatprep.subr.mxu0 %v4903_v1 }
 0xb79   :  { %4496 = vmatprep.subr.mxu1 %v4903_v1  ;;  %4486 = vmatpush3.msra.mxu0 %v5347_v38 }
 0xb7a   :  { %4497 = vmatpush3.msra.mxu1 %v5312_v33  ;;  %4487 = vmatprep.subr.mxu0 %v4903_v1 }
 0xb7b   :  { %4498 = vmatprep.subr.mxu1 %v4903_v1  ;;  %4488 = vmatpush3.msra.mxu0 %v5356_v39 }
 0xb7c   :  { %4499 = vmatpush3.msra.mxu1 %v5320_v35  ;;  %4489 = vmatprep.subr.mxu0 %v4903_v1  ;;  %v5822_v35 = vld [vmem:[%s6064_s9] ss:$0 sm:$0xff] }
 0xb7d   :  { %4500 = vmatprep.subr.mxu1 %v4903_v1  ;;  %4490 = vmatpush3.msra.mxu0 %v5365_v40 }
 0xb7e   :  { %4491 = vmatprep.mubr.msk.f32.mxu0 %vm4904_vm0, %v4903_v1  ;;  %4501 = vmatpush3.msra.mxu1 %v5329_v36 }
 0xb7f   :  { %4492 = vmatmul.mubr.msk.f32.vlgmr.msra.gmra.mxu0 %vm1341_vm2, %v5527_v29  ;;  %4502 = vmatprep.subr.mxu1 %v4903_v1 }
 0xb80   :  { %4513 = vmatprep.subr.mxu0 %v4903_v1  ;;  %4503 = vmatpush3.msra.mxu1 %v5338_v37 }
 0xb81   :  { %4514 = vmatpush3.msra.mxu0 %v5535_v32  ;;  %4504 = vmatprep.subr.mxu1 %v4903_v1 }
 0xb82   :  { %4515 = vmatprep.subr.mxu0 %v4903_v1  ;;  %4505 = vmatpush3.msra.mxu1 %v5347_v38 }
 0xb83   :  { %4516 = vmatpush3.msra.mxu0 %v5545_v34  ;;  %4506 = vmatprep.subr.mxu1 %v4903_v1 }
 0xb84   :  { %4517 = vmatprep.subr.mxu0 %v4903_v1  ;;  %4507 = vmatpush3.msra.mxu1 %v5356_v39 }
 0xb85   :  { %4518 = vmatpush3.msra.mxu0 %v5554_v41  ;;  %4508 = vmatprep.subr.mxu1 %v4903_v1 }
 0xb86   :  { %4519 = vmatprep.subr.mxu0 %v4903_v1  ;;  %4509 = vmatpush3.msra.mxu1 %v5365_v40 }
 0xb87   :  { %4510 = vmatprep.mubr.msk.f32.mxu1 %vm4904_vm0, %v4903_v1  ;;  %4520 = vmatpush3.msra.mxu0 %v5563_v54 }
 0xb88   :  { %4511 = vmatmul.mubr.msk.f32.vlgmr.msra.gmra.mxu1 %vm1341_vm2, %v5577_v56  ;;  %4521 = vmatprep.subr.mxu0 %v4903_v1 }
 0xb89   :  { %4532 = vmatprep.subr.mxu1 %v4903_v1  ;;  %4522 = vmatpush3.msra.mxu0 %v5572_v55 }
 0xb8a   :  { %4533 = vmatpush3.msra.mxu1 %v5535_v32  ;;  %4523 = vmatprep.subr.mxu0 %v4903_v1 }
 0xb8b   :  { %4534 = vmatprep.subr.mxu1 %v4903_v1  ;;  %4524 = vmatpush3.msra.mxu0 %v5588_v57 }
 0xb8c   :  { %4535 = vmatpush3.msra.mxu1 %v5545_v34  ;;  %4525 = vmatprep.subr.mxu0 %v4903_v1 }
 0xb8d   :  { %4536 = vmatprep.subr.mxu1 %v4903_v1  ;;  %4526 = vmatpush3.msra.mxu0 %v5597_v51 }
 0xb8e   :  { %4537 = vmatpush3.msra.mxu1 %v5554_v41  ;;  %4527 = vmatprep.subr.mxu0 %v4903_v1 }
 0xb8f   :  { %4538 = vmatprep.subr.mxu1 %v4903_v1  ;;  %4528 = vmatpush3.msra.mxu0 %v5606_v53 }
 0xb90   :  { %4529 = vmatprep.mubr.msk.f32.mxu0 %vm4904_vm0, %v4903_v1  ;;  %4539 = vmatpush3.msra.mxu1 %v5563_v54 }
 0xb91   :  { %4530 = vmatmul.mubr.msk.f32.vlgmr.msra.gmra.mxu0 %vm1341_vm2, %v5389_v49  ;;  %4540 = vmatprep.subr.mxu1 %v4903_v1 }
 0xb92   :  { %4551 = vmatprep.subr.mxu0 %v4903_v1  ;;  %4541 = vmatpush3.msra.mxu1 %v5572_v55 }
 0xb93   :  { %4552 = vmatpush3.msra.mxu0 %v5535_v32  ;;  %4542 = vmatprep.subr.mxu1 %v4903_v1 }
 0xb94   :  { %4553 = vmatprep.subr.mxu0 %v4903_v1  ;;  %4543 = vmatpush3.msra.mxu1 %v5588_v57 }
 0xb95   :  { %4554 = vmatpush3.msra.mxu0 %v5545_v34  ;;  %4544 = vmatprep.subr.mxu1 %v4903_v1 }
 0xb96   :  { %4555 = vmatprep.subr.mxu0 %v4903_v1  ;;  %4545 = vmatpush3.msra.mxu1 %v5597_v51 }
 0xb97   :  { %4556 = vmatpush3.msra.mxu0 %v5554_v41  ;;  %4546 = vmatprep.subr.mxu1 %v4903_v1 }
 0xb98   :  { %4557 = vmatprep.subr.mxu0 %v4903_v1  ;;  %4547 = vmatpush3.msra.mxu1 %v5606_v53 }
 0xb99   :  { %4548 = vmatprep.mubr.msk.f32.mxu1 %vm4904_vm0, %v4903_v1  ;;  %4558 = vmatpush3.msra.mxu0 %v5563_v54 }
 0xb9a   :  { %4549 = vmatmul.mubr.msk.f32.vlgmr.msra.gmra.mxu1 %vm1341_vm2, %v5405_v9  ;;  %4559 = vmatprep.subr.mxu0 %v4903_v1 }
 0xb9b   :  { %4570 = vmatprep.subr.mxu1 %v4903_v1  ;;  %4560 = vmatpush3.msra.mxu0 %v5572_v55 }
 0xb9c   :  { %4571 = vmatpush3.msra.mxu1 %v5535_v32  ;;  %4561 = vmatprep.subr.mxu0 %v4903_v1 }
 0xb9d   :  { %4572 = vmatprep.subr.mxu1 %v4903_v1  ;;  %4562 = vmatpush3.msra.mxu0 %v5588_v57 }
 0xb9e   :  { %4573 = vmatpush3.msra.mxu1 %v5545_v34  ;;  %4563 = vmatprep.subr.mxu0 %v4903_v1 }
 0xb9f   :  { %4574 = vmatprep.subr.mxu1 %v4903_v1  ;;  %4564 = vmatpush3.msra.mxu0 %v5597_v51 }
 0xba0   :  { %4575 = vmatpush3.msra.mxu1 %v5554_v41  ;;  %4565 = vmatprep.subr.mxu0 %v4903_v1 }
 0xba1   :  { %4576 = vmatprep.subr.mxu1 %v4903_v1  ;;  %4566 = vmatpush3.msra.mxu0 %v5606_v53 }
 0xba2   :  { %4567 = vmatprep.mubr.msk.f32.mxu0 %vm4904_vm0, %v4903_v1  ;;  %4577 = vmatpush3.msra.mxu1 %v5563_v54 }
 0xba3   :  { %4568 = vmatmul.mubr.msk.f32.vlgmr.msra.gmra.mxu0 %vm1341_vm2, %v5425_v12  ;;  %4578 = vmatprep.subr.mxu1 %v4903_v1 }
 0xba4   :  { %4589 = vmatprep.subr.mxu0 %v4903_v1  ;;  %4579 = vmatpush3.msra.mxu1 %v5572_v55 }
 0xba5   :  { %4590 = vmatpush3.msra.mxu0 %v5535_v32  ;;  %4580 = vmatprep.subr.mxu1 %v4903_v1 }
 0xba6   :  { %4591 = vmatprep.subr.mxu0 %v4903_v1  ;;  %4581 = vmatpush3.msra.mxu1 %v5588_v57 }
 0xba7   :  { %4592 = vmatpush3.msra.mxu0 %v5545_v34  ;;  %4582 = vmatprep.subr.mxu1 %v4903_v1 }
 0xba8   :  { %4593 = vmatprep.subr.mxu0 %v4903_v1  ;;  %4583 = vmatpush3.msra.mxu1 %v5597_v51 }
 0xba9   :  { %4594 = vmatpush3.msra.mxu0 %v5554_v41  ;;  %4584 = vmatprep.subr.mxu1 %v4903_v1 }
 0xbaa   :  { %4595 = vmatprep.subr.mxu0 %v4903_v1  ;;  %4585 = vmatpush3.msra.mxu1 %v5606_v53 }
 0xbab   :  { %4586 = vmatprep.mubr.msk.f32.mxu1 %vm4904_vm0, %v4903_v1  ;;  %4596 = vmatpush3.msra.mxu0 %v5563_v54 }
 0xbac   :  { %4587 = vmatmul.mubr.msk.f32.vlgmr.msra.gmra.mxu1 %vm1341_vm2, %v5451_v19  ;;  %4597 = vmatprep.subr.mxu0 %v4903_v1 }
 0xbad   :  { %4608 = vmatprep.subr.mxu1 %v4903_v1  ;;  %4598 = vmatpush3.msra.mxu0 %v5572_v55 }
 0xbae   :  { %4609 = vmatpush3.msra.mxu1 %v5535_v32  ;;  %4599 = vmatprep.subr.mxu0 %v4903_v1 }
 0xbaf   :  { %4610 = vmatprep.subr.mxu1 %v4903_v1  ;;  %4600 = vmatpush3.msra.mxu0 %v5588_v57 }
 0xbb0   :  { %4611 = vmatpush3.msra.mxu1 %v5545_v34  ;;  %4601 = vmatprep.subr.mxu0 %v4903_v1 }
 0xbb1   :  { %4612 = vmatprep.subr.mxu1 %v4903_v1  ;;  %4602 = vmatpush3.msra.mxu0 %v5597_v51 }
 0xbb2   :  { %4613 = vmatpush3.msra.mxu1 %v5554_v41  ;;  %4603 = vmatprep.subr.mxu0 %v4903_v1 }
 0xbb3   :  { %4614 = vmatprep.subr.mxu1 %v4903_v1  ;;  %4604 = vmatpush3.msra.mxu0 %v5606_v53 }
 0xbb4   :  { %4605 = vmatprep.mubr.msk.f32.mxu0 %vm4904_vm0, %v4903_v1  ;;  %4615 = vmatpush3.msra.mxu1 %v5563_v54 }
 0xbb5   :  { %4606 = vmatmul.mubr.msk.f32.vlgmr.msra.gmra.mxu0 %vm1341_vm2, %v5476_v22  ;;  %4616 = vmatprep.subr.mxu1 %v4903_v1 }
 0xbb6   :  { %4627 = vmatprep.subr.mxu0 %v4903_v1  ;;  %4617 = vmatpush3.msra.mxu1 %v5572_v55 }
 0xbb7   :  { %4628 = vmatpush3.msra.mxu0 %v5535_v32  ;;  %4618 = vmatprep.subr.mxu1 %v4903_v1 }
 0xbb8   :  { %4629 = vmatprep.subr.mxu0 %v4903_v1  ;;  %4619 = vmatpush3.msra.mxu1 %v5588_v57 }
 0xbb9   :  { %4630 = vmatpush3.msra.mxu0 %v5545_v34  ;;  %4620 = vmatprep.subr.mxu1 %v4903_v1 }
 0xbba   :  { %4631 = vmatprep.subr.mxu0 %v4903_v1  ;;  %4621 = vmatpush3.msra.mxu1 %v5597_v51 }
 0xbbb   :  { %4632 = vmatpush3.msra.mxu0 %v5554_v41  ;;  %4622 = vmatprep.subr.mxu1 %v4903_v1 }
 0xbbc   :  { %4633 = vmatprep.subr.mxu0 %v4903_v1  ;;  %4623 = vmatpush3.msra.mxu1 %v5606_v53 }
 0xbbd   :  { %4624 = vmatprep.mubr.msk.f32.mxu1 %vm4904_vm0, %v4903_v1  ;;  %4634 = vmatpush3.msra.mxu0 %v5563_v54 }
 0xbbe   :  { %4625 = vmatmul.mubr.msk.f32.vlgmr.msra.gmra.mxu1 %vm1341_vm2, %v5501_v27  ;;  %4635 = vmatprep.subr.mxu0 %v4903_v1 }
 0xbbf   :  { %4646 = vmatprep.subr.mxu1 %v4903_v1  ;;  %4636 = vmatpush3.msra.mxu0 %v5572_v55 }
 0xbc0   :  { %4647 = vmatpush3.msra.mxu1 %v5535_v32  ;;  %4637 = vmatprep.subr.mxu0 %v4903_v1 }
 0xbc1   :  { %4648 = vmatprep.subr.mxu1 %v4903_v1  ;;  %4638 = vmatpush3.msra.mxu0 %v5588_v57 }
 0xbc2   :  { %4649 = vmatpush3.msra.mxu1 %v5545_v34  ;;  %4639 = vmatprep.subr.mxu0 %v4903_v1 }
 0xbc3   :  { %4650 = vmatprep.subr.mxu1 %v4903_v1  ;;  %4640 = vmatpush3.msra.mxu0 %v5597_v51 }
 0xbc4   :  { %4651 = vmatpush3.msra.mxu1 %v5554_v41  ;;  %4641 = vmatprep.subr.mxu0 %v4903_v1 }
 0xbc5   :  { %4652 = vmatprep.subr.mxu1 %v4903_v1  ;;  %4642 = vmatpush3.msra.mxu0 %v5606_v53 }
 0xbc6   :  { %4643 = vmatprep.mubr.msk.f32.mxu0 %vm4904_vm0, %v4903_v1  ;;  %4653 = vmatpush3.msra.mxu1 %v5563_v54 }
 0xbc7   :  { %4644 = vmatmul.mubr.msk.f32.vlgmr.msra.gmra.mxu0 %vm1341_vm2, %v5527_v29  ;;  %4654 = vmatprep.subr.mxu1 %v4903_v1 }
 0xbc8   :  { %4665 = vmatprep.subr.mxu0 %v4903_v1  ;;  %4655 = vmatpush3.msra.mxu1 %v5572_v55 }
 0xbc9   :  { %4666 = vmatpush3.msra.mxu0 %v5740_v58  ;;  %4656 = vmatprep.subr.mxu1 %v4903_v1 }
 0xbca   :  { %4667 = vmatprep.subr.mxu0 %v4903_v1  ;;  %4657 = vmatpush3.msra.mxu1 %v5588_v57 }
 0xbcb   :  { %4668 = vmatpush3.msra.mxu0 %v5750_v59  ;;  %4658 = vmatprep.subr.mxu1 %v4903_v1 }
 0xbcc   :  { %4669 = vmatprep.subr.mxu0 %v4903_v1  ;;  %4659 = vmatpush3.msra.mxu1 %v5597_v51 }
 0xbcd   :  { %4670 = vmatpush3.msra.mxu0 %v5759_v60  ;;  %4660 = vmatprep.subr.mxu1 %v4903_v1 }
 0xbce   :  { %4671 = vmatprep.subr.mxu0 %v4903_v1  ;;  %4661 = vmatpush3.msra.mxu1 %v5606_v53 }
 0xbcf   :  { %4662 = vmatprep.mubr.msk.f32.mxu1 %vm4904_vm0, %v4903_v1  ;;  %4672 = vmatpush3.msra.mxu0 %v5768_v61 }
 0xbd0   :  { %4673 = vmatprep.mubr.msk.f32.mxu0 %vm4904_vm0, %v4903_v1  ;;  %4663 = vmatmul.mubr.msk.f32.vlgmr.msra.gmra.mxu1 %vm1341_vm2, %v5577_v56 }
 0xbd1   :  { %4674 = vmatmul.mubr.f32.vlgmr.msra.gmra.mxu0 %v4903_v1  ;;  %4676 = vmatprep.subr.mxu1 %v4903_v1 }
 0xbd2   :  { %4677 = vmatpush3.msra.mxu1 %v5740_v58  ;;  %4684 = vmatprep.mubr.msk.f32.mxu1 %vm4904_vm0, %v4903_v1 }
 0xbd3   :  { %4678 = vmatprep.subr.mxu1 %v4903_v1  ;;  %4687 = vmatprep.subr.mxu0 %v4903_v1 }
 0xbd4   :  { %4679 = vmatpush3.msra.mxu1 %v5750_v59  ;;  %4688 = vmatpush3.msra.mxu0 %v5740_v58 }
 0xbd5   :  { %4680 = vmatprep.subr.mxu1 %v4903_v1  ;;  %4689 = vmatprep.subr.mxu0 %v4903_v1 }
 0xbd6   :  { %4681 = vmatpush3.msra.mxu1 %v5759_v60  ;;  %4690 = vmatpush3.msra.mxu0 %v5750_v59 }
 0xbd7   :  { %4682 = vmatprep.subr.mxu1 %v4903_v1  ;;  %4691 = vmatprep.subr.mxu0 %v4903_v1 }
 0xbd8   :  { %4683 = vmatpush3.msra.mxu1 %v5768_v61  ;;  %4692 = vmatpush3.msra.mxu0 %v5759_v60 }
 0xbd9   :  { %4693 = vmatprep.subr.mxu0 %v4903_v1  ;;  %4695 = vmatprep.mubr.msk.f32.mxu0 %vm4904_vm0, %v4903_v1 }
 0xbda   :  { %4694 = vmatpush3.msra.mxu0 %v5768_v61  ;;  %4698 = vmatprep.subr.mxu1 %v4903_v1 }
 0xbdb   :  { %4709 = vmatprep.subr.mxu0 %v4903_v1 }
 0xc0b   :  { %v1411_v62 = vpop.f32.mrf.mxu0 }
 0xc0c   :  { %v1412_v24 = vadd.f32 %v3842_v0, %v1411_v62 }
 0xc0d   :  { %v4379_v63 = vpop.f32.mrf.mxu0 }
 0xc13   :  { %v1484_v2 = vpop.f32.mrf.mxu1 }
 0xc14   :  { %v1485_v3 = vadd.f32 %v3842_v0, %v1484_v2 }
 0xc15   :  { %v4398_v4 = vpop.f32.mrf.mxu1 }
 0xc1b   :  { %v1557_v5 = vpop.f32.mrf.mxu0 }
 0xc1c   :  { %v5807_v6 = vadd.f32 %v3842_v0, %v1557_v5 }
 0xc1d   :  { %v4417_v8 = vpop.f32.mrf.mxu0 }
 0xc24   :  { %v1630_v10 = vpop.f32.mrf.mxu1 }
 0xc25   :  { %v5809_v11 = vadd.f32 %v3842_v0, %v1630_v10 }
 0xc26   :  { %v4436_v13 = vpop.f32.mrf.mxu1 }
 0xc2d   :  { %v1703_v15 = vpop.f32.mrf.mxu0 }
 0xc2e   :  { %v5811_v16 = vadd.f32 %v3842_v0, %v1703_v15 }
 0xc2f   :  { %v4455_v18 = vpop.f32.mrf.mxu0 }
 0xc36   :  { %v1776_v20 = vpop.f32.mrf.mxu1 }
 0xc37   :  { %v5813_v21 = vadd.f32 %v3842_v0, %v1776_v20 }
 0xc38   :  { %v4474_v23 = vpop.f32.mrf.mxu1 }
 0xc3f   :  { %v1849_v25 = vpop.f32.mrf.mxu0 }
 0xc40   :  { %v5815_v26 = vadd.f32 %v3842_v0, %v1849_v25 }
 0xc41   :  { %v4493_v28 = vpop.f32.mrf.mxu0 }
 0xc48   :  { %v1922_v30 = vpop.f32.mrf.mxu1 }
 0xc49   :  { %v5817_v31 = vadd.f32 %v3842_v0, %v1922_v30 }
 0xc4a   :  { %v4512_v33 = vpop.f32.mrf.mxu1 }
 0xc51   :  { %v1998_v36 = vpop.f32.mrf.mxu0 }
 0xc52   :  { %v5825_v37 = vadd.f32 %v5822_v35, %v1998_v36 }
 0xc53   :  { %v4531_v38 = vpop.f32.mrf.mxu0 }
 0xc5a   :  { %v2068_v39 = vpop.f32.mrf.mxu1 }
 0xc5b   :  { %v5828_v40 = vadd.f32 %v5822_v35, %v2068_v39 }
 0xc5c   :  { %v4550_v42 = vpop.f32.mrf.mxu1 }
 0xc63   :  { %v2138_v44 = vpop.f32.mrf.mxu0 }
 0xc64   :  { %v5831_v45 = vadd.f32 %v5822_v35, %v2138_v44 }
 0xc65   :  { %v4569_v46 = vpop.f32.mrf.mxu0 }
 0xc6c   :  { %v2208_v47 = vpop.f32.mrf.mxu1 }
 0xc6d   :  { %v5834_v48 = vadd.f32 %v5822_v35, %v2208_v47 }
 0xc6e   :  { %v4588_v49 = vpop.f32.mrf.mxu1 }
 0xc75   :  { %v2278_v50 = vpop.f32.mrf.mxu0 }
 0xc76   :  { %v5837_v7 = vadd.f32 %v5822_v35, %v2278_v50 }
 0xc77   :  { %v4607_v9 = vpop.f32.mrf.mxu0 }
 0xc7e   :  { %v2348_v52 = vpop.f32.mrf.mxu1 }
 0xc7f   :  { %v5840_v12 = vadd.f32 %v5822_v35, %v2348_v52 }
 0xc80   :  { %v4626_v14 = vpop.f32.mrf.mxu1 }
 0xc87   :  { %v2418_v17 = vpop.f32.mrf.mxu0 }
 0xc88   :  { %v5843_v19 = vadd.f32 %v5822_v35, %v2418_v17 }
 0xc89   :  { %v4645_v22 = vpop.f32.mrf.mxu0 }
 0xc90   :  { %v5845_v27 = vpop.f32.mrf.mxu1 }
 0xc91   :  { %v2562_v29 = vpop.f32.mrf.mxu0  ;;  %v2489_v25 = vadd.f32 %v5822_v35, %v5845_v27 }
 0xc92   :  { %v2566_v32 = vadd.f32 %v2562_v29, %v1412_v24  ;;  %v4664_v34 = vpop.f32.mrf.mxu1 }
 0xc93   :  { %v4675_v41 = vpop.f32.mrf.mxu0  ;;  %v3701_v34 = vld [vmem:[%s6065_s10 + $0x18] sm:$0xff] }
 0xc94   :  { %v2567_v43 = vmax.f32 %v2566_v32, 0.0 }
 0xc96   :  { %4685 = vmatmul.mubr.msk.f32.vlgmr.msra.gmra.mxu1 %vm79_vm1, %v2567_v43 }
 0xc97   :  { %4699 = vmatpush3.msra.mxu1 %v5740_v58  ;;  %4706 = vmatprep.mubr.msk.f32.mxu1 %vm4904_vm0, %v4903_v1 }
 0xc98   :  { %4700 = vmatprep.subr.mxu1 %v4903_v1 }
 0xc99   :  { %4701 = vmatpush3.msra.mxu1 %v5750_v59 }
 0xc9a   :  { %4702 = vmatprep.subr.mxu1 %v4903_v1 }
 0xc9b   :  { %4703 = vmatpush3.msra.mxu1 %v5759_v60 }
 0xc9c   :  { %4704 = vmatprep.subr.mxu1 %v4903_v1 }
 0xc9d   :  { %4705 = vmatpush3.msra.mxu1 %v5768_v61 }
 0xc9e   :  { %4720 = vmatprep.subr.mxu1 %v4903_v1 }
 0xd56   :  { %v2637_v54 = vpop.f32.mrf.mxu1 }
 0xd57   :  { %v2641_v55 = vadd.f32 %v2637_v54, %v1485_v3 }
 0xd58   :  { %v4686_v56 = vpop.f32.mrf.mxu1 }
 0xd59   :  { %v2642_v57 = vmax.f32 %v2641_v55, 0.0  ;;  %v3699_v56 = vld [vmem:[%s6065_s10 + $0x8] sm:$0xff] }
 0xd5b   :  { %4696 = vmatmul.mubr.msk.f32.vlgmr.msra.gmra.mxu0 %vm79_vm1, %v2642_v57 }
 0xd5c   :  { %4710 = vmatpush3.msra.mxu0 %v5740_v58  ;;  %4717 = vmatprep.mubr.msk.f32.mxu0 %vm4904_vm0, %v4903_v1 }
 0xd5d   :  { %4711 = vmatprep.subr.mxu0 %v4903_v1 }
 0xd5e   :  { %4712 = vmatpush3.msra.mxu0 %v5750_v59 }
 0xd5f   :  { %4713 = vmatprep.subr.mxu0 %v4903_v1 }
 0xd60   :  { %4714 = vmatpush3.msra.mxu0 %v5759_v60 }
 0xd61   :  { %4715 = vmatprep.subr.mxu0 %v4903_v1 }
 0xd62   :  { %4716 = vmatpush3.msra.mxu0 %v5768_v61 }
 0xd63   :  { %4731 = vmatprep.subr.mxu0 %v4903_v1 }
 0xe1b   :  { %v2712_v51 = vpop.f32.mrf.mxu0 }
 0xe1c   :  { %v2716_v53 = vadd.f32 %v2712_v51, %v5807_v6 }
 0xe1d   :  { %v4697_v62 = vpop.f32.mrf.mxu0 }
 0xe1e   :  { %v2717_v63 = vmax.f32 %v2716_v53, 0.0 }
 0xe20   :  { %4707 = vmatmul.mubr.msk.f32.vlgmr.msra.gmra.mxu1 %vm79_vm1, %v2717_v63 }
 0xe21   :  { %4721 = vmatpush3.msra.mxu1 %v5740_v58  ;;  %4728 = vmatprep.mubr.msk.f32.mxu1 %vm4904_vm0, %v4903_v1 }
 0xe22   :  { %4722 = vmatprep.subr.mxu1 %v4903_v1 }
 0xe23   :  { %4723 = vmatpush3.msra.mxu1 %v5750_v59 }
 0xe24   :  { %4724 = vmatprep.subr.mxu1 %v4903_v1 }
 0xe25   :  { %4725 = vmatpush3.msra.mxu1 %v5759_v60 }
 0xe26   :  { %4726 = vmatprep.subr.mxu1 %v4903_v1 }
 0xe27   :  { %4727 = vmatpush3.msra.mxu1 %v5768_v61 }
 0xe28   :  { %4742 = vmatprep.subr.mxu1 %v4903_v1 }
 0xee0   :  { %v2787_v0 = vpop.f32.mrf.mxu1 }
 0xee1   :  { %v2791_v2 = vadd.f32 %v2787_v0, %v5809_v11 }
 0xee2   :  { %v4708_v3 = vpop.f32.mrf.mxu1 }
 0xee3   :  { %v2792_v4 = vmax.f32 %v2791_v2, 0.0 }
 0xee5   :  { %4718 = vmatmul.mubr.msk.f32.vlgmr.msra.gmra.mxu0 %vm79_vm1, %v2792_v4 }
 0xee6   :  { %4732 = vmatpush3.msra.mxu0 %v5740_v58  ;;  %4739 = vmatprep.mubr.msk.f32.mxu0 %vm4904_vm0, %v4903_v1 }
 0xee7   :  { %4733 = vmatprep.subr.mxu0 %v4903_v1 }
 0xee8   :  { %4734 = vmatpush3.msra.mxu0 %v5750_v59 }
 0xee9   :  { %4735 = vmatprep.subr.mxu0 %v4903_v1 }
 0xeea   :  { %4736 = vmatpush3.msra.mxu0 %v5759_v60 }
 0xeeb   :  { %4737 = vmatprep.subr.mxu0 %v4903_v1 }
 0xeec   :  { %4738 = vmatpush3.msra.mxu0 %v5768_v61 }
 0xeed   :  { %4753 = vmatprep.subr.mxu0 %v4903_v1 }
 0xfa5   :  { %v2862_v5 = vpop.f32.mrf.mxu0 }
 0xfa6   :  { %v2866_v6 = vadd.f32 %v2862_v5, %v5811_v16  ;;  %v5909_v16 = vld [vmem:[%s6063_s8 + $0x18] sm:$0xff] }
 0xfa7   :  { %v4719_v8 = vpop.f32.mrf.mxu0 }
 0xfa8   :  { %v2867_v10 = vmax.f32 %v2866_v6, 0.0 }
 0xfaa   :  { %4729 = vmatmul.mubr.msk.f32.vlgmr.msra.gmra.mxu1 %vm79_vm1, %v2867_v10 }
 0xfab   :  { %4743 = vmatpush3.msra.mxu1 %v5740_v58  ;;  %4750 = vmatprep.mubr.msk.f32.mxu1 %vm4904_vm0, %v4903_v1 }
 0xfac   :  { %4744 = vmatprep.subr.mxu1 %v4903_v1 }
 0xfad   :  { %4745 = vmatpush3.msra.mxu1 %v5750_v59  ;;  %v5915_v59 = vld [vmem:[%s6063_s8 + $0x10] sm:$0xff] }
 0xfae   :  { %4746 = vmatprep.subr.mxu1 %v4903_v1 }
 0xfaf   :  { %4747 = vmatpush3.msra.mxu1 %v5759_v60  ;;  %v5924_v60 = vld [vmem:[%s6063_s8 + $0x8] sm:$0xff] }
 0xfb0   :  { %4748 = vmatprep.subr.mxu1 %v4903_v1 }
 0xfb1   :  { %4749 = vmatpush3.msra.mxu1 %v5768_v61  ;;  %v5931_v61 = vld [vmem:[%s6063_s8] sm:$0xff] }
 0xfb2   :  { %4764 = vmatprep.subr.mxu1 %v4903_v1 }
0x106a   :  { %v2937_v11 = vpop.f32.mrf.mxu1 }
0x106b   :  { %v2941_v58 = vadd.f32 %v2937_v11, %v5813_v21 }
0x106c   :  { %v4730_v13 = vpop.f32.mrf.mxu1 }
0x106d   :  { %v2942_v15 = vmax.f32 %v2941_v58, 0.0 }
0x106f   :  { %4740 = vmatmul.mubr.msk.f32.vlgmr.msra.gmra.mxu0 %vm79_vm1, %v2942_v15 }
0x1070   :  { %4754 = vmatpush3.msra.mxu0 %v5909_v16  ;;  %4761 = vmatprep.mubr.msk.f32.mxu0 %vm4904_vm0, %v4903_v1 }
0x1071   :  { %4755 = vmatprep.subr.mxu0 %v4903_v1 }
0x1072   :  { %4756 = vmatpush3.msra.mxu0 %v5915_v59 }
0x1073   :  { %4757 = vmatprep.subr.mxu0 %v4903_v1 }
0x1074   :  { %4758 = vmatpush3.msra.mxu0 %v5924_v60 }
0x1075   :  { %4759 = vmatprep.subr.mxu0 %v4903_v1 }
0x1076   :  { %4760 = vmatpush3.msra.mxu0 %v5931_v61 }
0x1077   :  { %4762 = vmatmul.mubr.f32.vlgmr.msra.gmra.mxu0 %v4903_v1  ;;  %4775 = vmatprep.subr.mxu0 %v4903_v1 }
0x1078   :  { %4776 = vmatpush3.msra.mxu0 %v5909_v16  ;;  %4783 = vmatprep.mubr.msk.f32.mxu0 %vm4904_vm0, %v4903_v1 }
0x1079   :  { %4777 = vmatprep.subr.mxu0 %v4903_v1 }
0x107a   :  { %4778 = vmatpush3.msra.mxu0 %v5915_v59 }
0x107b   :  { %4779 = vmatprep.subr.mxu0 %v4903_v1 }
0x107c   :  { %4780 = vmatpush3.msra.mxu0 %v5924_v60 }
0x107d   :  { %4781 = vmatprep.subr.mxu0 %v4903_v1 }
0x107e   :  { %4782 = vmatpush3.msra.mxu0 %v5931_v61 }
0x107f   :  { %4797 = vmatprep.subr.mxu0 %v4903_v1 }
0x112f   :  { %v3012_v18 = vpop.f32.mrf.mxu0 }
0x1130   :  { %v3016_v20 = vadd.f32 %v3012_v18, %v5815_v26 }
0x1131   :  { %v4741_v21 = vpop.f32.mrf.mxu0 }
0x1132   :  { %v3017_v23 = vmax.f32 %v3016_v20, 0.0 }
0x1134   :  { %4751 = vmatmul.mubr.msk.f32.vlgmr.msra.gmra.mxu1 %vm79_vm1, %v3017_v23 }
0x1135   :  { %4765 = vmatpush3.msra.mxu1 %v5909_v16  ;;  %4772 = vmatprep.mubr.msk.f32.mxu1 %vm4904_vm0, %v4903_v1 }
0x1136   :  { %4766 = vmatprep.subr.mxu1 %v4903_v1 }
0x1137   :  { %v3163_v28 = vpop.f32.mrf.mxu0  ;;  %4767 = vmatpush3.msra.mxu1 %v5915_v59 }
0x1138   :  { %v3167_v30 = vadd.f32 %v3163_v28, %v2489_v25  ;;  %4768 = vmatprep.subr.mxu1 %v4903_v1 }
0x1139   :  { %v4763_v26 = vpop.f32.mrf.mxu0  ;;  %4769 = vmatpush3.msra.mxu1 %v5924_v60 }
0x113a   :  { %v3168_v33 = vmax.f32 %v3167_v30, 0.0  ;;  %4770 = vmatprep.subr.mxu1 %v4903_v1 }
0x113b   :  { %4771 = vmatpush3.msra.mxu1 %v5931_v61 }
0x113c   :  { %4773 = vmatmul.mubr.msk.f32.vlgmr.msra.gmra.mxu1 %vm79_vm1, %v3168_v33  ;;  %4786 = vmatprep.subr.mxu1 %v4903_v1 }
0x113d   :  { %4787 = vmatpush3.msra.mxu1 %v5909_v16  ;;  %4794 = vmatprep.mubr.msk.f32.mxu1 %vm4904_vm0, %v4903_v1 }
0x113e   :  { %4788 = vmatprep.subr.mxu1 %v4903_v1 }
0x113f   :  { %4789 = vmatpush3.msra.mxu1 %v5915_v59 }
0x1140   :  { %4790 = vmatprep.subr.mxu1 %v4903_v1 }
0x1141   :  { %4791 = vmatpush3.msra.mxu1 %v5924_v60 }
0x1142   :  { %4792 = vmatprep.subr.mxu1 %v4903_v1 }
0x1143   :  { %4793 = vmatpush3.msra.mxu1 %v5931_v61 }
0x1144   :  { %4808 = vmatprep.subr.mxu1 %v4903_v1 }
0x11f4   :  { %v3087_v35 = vpop.f32.mrf.mxu1 }
0x11f5   :  { %v3091_v36 = vadd.f32 %v3087_v35, %v5817_v31 }
0x11f6   :  { %v4752_v38 = vpop.f32.mrf.mxu1 }
0x11f7   :  { %v3092_v39 = vmax.f32 %v3091_v36, 0.0 }
0x11f9   :  { %3695 = vst.msk [vmem:[#allocation4 + $0x10] sm:$0xff] %vm79_vm1, %v3092_v39 }
0x11fc   :  { %v3238_v42 = vpop.f32.mrf.mxu1 }
0x11fd   :  { %v3242_v44 = vadd.f32 %v3238_v42, %v5843_v19 }
0x11fe   :  { %v4774_v46 = vpop.f32.mrf.mxu1 }
0x11ff   :  { %v3243_v47 = vmax.f32 %v3242_v44, 0.0 }
0x1201   :  { %4784 = vmatmul.mubr.msk.f32.vlgmr.msra.gmra.mxu0 %vm79_vm1, %v3243_v47 }
0x1202   :  { %4798 = vmatpush3.msra.mxu0 %v5909_v16  ;;  %4805 = vmatprep.mubr.msk.f32.mxu0 %vm4904_vm0, %v4903_v1 }
0x1203   :  { %4799 = vmatprep.subr.mxu0 %v4903_v1 }
0x1204   :  { %4800 = vmatpush3.msra.mxu0 %v5915_v59 }
0x1205   :  { %4801 = vmatprep.subr.mxu0 %v4903_v1 }
0x1206   :  { %4802 = vmatpush3.msra.mxu0 %v5924_v60 }
0x1207   :  { %4803 = vmatprep.subr.mxu0 %v4903_v1 }
0x1208   :  { %4804 = vmatpush3.msra.mxu0 %v5931_v61 }
0x1209   :  { %4819 = vmatprep.subr.mxu0 %v4903_v1 }
0x12c1   :  { %v3313_v31 = vpop.f32.mrf.mxu0 }
0x12c2   :  { %v3317_v49 = vadd.f32 %v3313_v31, %v5840_v12 }
0x12c3   :  { %v4785_v50 = vpop.f32.mrf.mxu0 }
0x12c4   :  { %v3318_v9 = vmax.f32 %v3317_v49, 0.0 }
0x12c6   :  { %4795 = vmatmul.mubr.msk.f32.vlgmr.msra.gmra.mxu1 %vm79_vm1, %v3318_v9 }
0x12c7   :  { %4809 = vmatpush3.msra.mxu1 %v5909_v16  ;;  %4816 = vmatprep.mubr.msk.f32.mxu1 %vm4904_vm0, %v4903_v1 }
0x12c8   :  { %4810 = vmatprep.subr.mxu1 %v4903_v1 }
0x12c9   :  { %4811 = vmatpush3.msra.mxu1 %v5915_v59 }
0x12ca   :  { %4812 = vmatprep.subr.mxu1 %v4903_v1 }
0x12cb   :  { %4813 = vmatpush3.msra.mxu1 %v5924_v60 }
0x12cc   :  { %4814 = vmatprep.subr.mxu1 %v4903_v1 }
0x12cd   :  { %4815 = vmatpush3.msra.mxu1 %v5931_v61 }
0x12ce   :  { %4830 = vmatprep.subr.mxu1 %v4903_v1 }
0x1386   :  { %v3388_v52 = vpop.f32.mrf.mxu1 }
0x1387   :  { %v3392_v12 = vadd.f32 %v3388_v52, %v5837_v7 }
0x1388   :  { %v4796_v14 = vpop.f32.mrf.mxu1 }
0x1389   :  { %v3393_v17 = vmax.f32 %v3392_v12, 0.0 }
0x138b   :  { %4806 = vmatmul.mubr.msk.f32.vlgmr.msra.gmra.mxu0 %vm79_vm1, %v3393_v17 }
0x138c   :  { %4820 = vmatpush3.msra.mxu0 %v5909_v16  ;;  %4827 = vmatprep.mubr.msk.f32.mxu0 %vm4904_vm0, %v4903_v1 }
0x138d   :  { %4821 = vmatprep.subr.mxu0 %v4903_v1 }
0x138e   :  { %4822 = vmatpush3.msra.mxu0 %v5915_v59 }
0x138f   :  { %4823 = vmatprep.subr.mxu0 %v4903_v1 }
0x1390   :  { %4824 = vmatpush3.msra.mxu0 %v5924_v60 }
0x1391   :  { %4825 = vmatprep.subr.mxu0 %v4903_v1 }
0x1392   :  { %4826 = vmatpush3.msra.mxu0 %v5931_v61 }
0x1393   :  { %4841 = vmatprep.subr.mxu0 %v4903_v1 }
0x144b   :  { %v3463_v7 = vpop.f32.mrf.mxu0 }
0x144c   :  { %v3467_v19 = vadd.f32 %v3463_v7, %v5834_v48 }
0x144d   :  { %v4807_v22 = vpop.f32.mrf.mxu0 }
0x144e   :  { %v3468_v24 = vmax.f32 %v3467_v19, 0.0 }
0x1450   :  { %4817 = vmatmul.mubr.msk.f32.vlgmr.msra.gmra.mxu1 %vm79_vm1, %v3468_v24 }
0x1451   :  { %4831 = vmatpush3.msra.mxu1 %v5909_v16  ;;  %4838 = vmatprep.mubr.msk.f32.mxu1 %vm4904_vm0, %v4903_v1 }
0x1452   :  { %4832 = vmatprep.subr.mxu1 %v4903_v1 }
0x1453   :  { %4833 = vmatpush3.msra.mxu1 %v5915_v59 }
0x1454   :  { %4834 = vmatprep.subr.mxu1 %v4903_v1 }
0x1455   :  { %4835 = vmatpush3.msra.mxu1 %v5924_v60 }
0x1456   :  { %4836 = vmatprep.subr.mxu1 %v4903_v1 }
0x1457   :  { %4837 = vmatpush3.msra.mxu1 %v5931_v61 }
0x1510   :  { %v3538_v48 = vpop.f32.mrf.mxu1 }
0x1511   :  { %v3542_v27 = vadd.f32 %v3538_v48, %v5831_v45  ;;  %v3700_v45 = vld [vmem:[%s6065_s10 + $0x10] sm:$0xff] }
0x1512   :  { %v4818_v29 = vpop.f32.mrf.mxu1 }
0x1513   :  { %v3543_v32 = vmax.f32 %v3542_v27, 0.0 }
0x1515   :  { %4828 = vmatmul.mubr.msk.f32.vlgmr.msra.gmra.mxu0 %vm79_vm1, %v3543_v32 }
0x1516   :  { %4849 = vmatprep.mubr.msk.f32.mxu0 %vm4904_vm0, %v4903_v1  ;;  %4842 = vmatpush3.msra.mxu0 %v3701_v34 }
0x1517   :  { %4843 = vmatprep.subr.mxu0 %v4903_v1 }
0x1518   :  { %4844 = vmatpush3.msra.mxu0 %v3700_v45 }
0x1519   :  { %4845 = vmatprep.subr.mxu0 %v4903_v1 }
0x151a   :  { %4846 = vmatpush3.msra.mxu0 %v3699_v56 }
0x151b   :  { %4847 = vmatprep.subr.mxu0 %v4903_v1 }
0x15d5   :  { %v3613_v41 = vpop.f32.mrf.mxu0 }
0x15d6   :  { %v3617_v43 = vadd.f32 %v3613_v41, %v5828_v40  ;;  %v3698_v40 = vld [vmem:[%s6065_s10] sm:$0xff] }
0x15d7   :  { %v4829_v54 = vpop.f32.mrf.mxu0  ;;  %4848 = vmatpush3.msra.mxu0 %v3698_v40 }
0x15d8   :  { %v3618_v55 = vmax.f32 %v3617_v43, 0.0 }
0x15da   :  { %4839 = vmatmul.mubr.msk.f32.vlgmr.msra.gmra.mxu1 %vm79_vm1, %v3618_v55 }
0x169a   :  { %v3688_v57 = vpop.f32.mrf.mxu1 }
0x169b   :  { %v3692_v51 = vadd.f32 %v3688_v57, %v5825_v37 }
0x169c   :  { %v4840_v53 = vpop.f32.mrf.mxu1 }
0x169d   :  { %v3693_v62 = vmax.f32 %v3692_v51, 0.0 }
0x169f   :  { %3697 = vst.msk [vmem:[#allocation4 + $0x18] sm:$0xff] %vm79_vm1, %v3693_v62  ;;  %4850 = vmatmul.mubr.msk.f32.vlgmr.msra.gmra.mxu0 %vm79_vm1, %v3693_v62 }
0x16a0   :  { %4870 = shalt.err (!%p4867_p4)
}
0x16a1   :  { %s4907_s10 = smov 128   ;;  %s4908_s30 = smov 8   ;;  %v3874_v1 = vld [vmem:[%s6066_s11] ss:$0 sm:$0xff]  ;;  %vm3782_vm3 = vcmask 130048  }
0x16a2   :  { %3805 = dma.vmem_to_hbm [thread:$0]  %s3800_s28, 512, %s6068_s13, [#allocation5], %s4907_s10, %s4907_s10, %s4908_s30  }
0x16a3   :  { %s4909_s27 = smov [#allocation2]  }
0x16a4   :  { %s3790_s6 = sshll.u32 %s4909_s27, 4  ;;  %s3791_s6 = int_to_ptr.vmem [resolvable:$true] %s3790_s6 }
0x16a5   :  { %s4879_s15 = scalar_lea.vmem %s3791_s6, 128  ;;  %p4884_p6 = scmp.lt.s32.totalorder %s3791_s6, %s3791_s6 }
0x16a6   :  { %p4880_p5 = scmp.ne.s32.totalorder %s3791_s6, %s4879_s15  ;;  %p4885_p7 = scmp.lt.s32.totalorder %s4879_s15, %s4879_s15 }
0x16a8   :  { %p4886_p8 = por %p4885_p7, %p4884_p6 }
0x16aa   :  { %p4887_p9 = pnand %p4886_p8, %p4880_p5 }
0x175f   :  { %v3778_v37 = vpop.f32.mrf.mxu0 }
0x1760   :  { %v3779_v63 = vadd.f32 %v3874_v1, %v3778_v37 }
0x1761   :  { %v4851_v0 = vpop.f32.mrf.mxu0 }
0x1762   :  { %3783 = vst.msk [vmem:[#allocation2] sm:$0xff] %vm3782_vm3, %v3779_v63 }
0x1763   :  { %4890 = shalt.err (!%p4887_p9)
}
0x1764   :  { %3793 = dma.vmem_to_hbm [thread:$0]  %s3791_s6, 128, %s6067_s12, [#allocation3]  }
0x1765   :  { %4899 = dma.done.wait [#allocation3], 128  }
0x1766   :  { %4900 = vsyncadd [#allocation3], 4294967168 }
0x1767   :  { %4901 = dma.done.wait [#allocation5], 512  }
0x1768   :  { %4902 = vsyncadd [#allocation5], 4294966784 }
0x1769   :  { %3812 = vsyncpa [#allocation3], 1 }
0x176a   :  { %3813 = vsyncpa [#allocation5], 1 }

</bundles_post_ra>
